<compile_context>
chip_gen: v7x
topology: tpu7x:2x2x1
jax: 0.10.0
libtpu: 0.0.40
codegen_flags: <defaults>
</compile_context>

<pallas_src>
import jax
import jax.numpy as jnp
from jax.experimental import pallas as pl

H_REC = 26   # recurrent hidden size (fc2 / conv3 output width)
H_HID = 32   # conv hidden size
H_PAD = 32   # padded recurrent width

# Row offsets of the transposed weights inside the packed weight slab.
R_W1H, R_W2, R_W3, R_FC2, R_FC3, R_FC4 = 0, 32, 64, 96, 128, 160
W_ROWS = 168   # 5 * 32 + 1, padded up to a multiple of 8 sublanes


def _rnn_kernel(const_ref, ahatT_ref, wslab_ref, res_ref):
    f32 = jnp.float32
    relu = lambda v: jnp.maximum(v, 0.0)
    T, N = res_ref.shape

    # Slot indices inside the packed const slab (layout built in the wrapper).
    S_WFC1, S_BFC1, S_BFC2 = T, T + 1, T + 2
    S_B1, S_B2, S_B3, S_BFC3 = T + 3, T + 4, T + 5, T + 6

    # Loop-invariant operands, loaded once via static slices of the slabs.
    ahatT = ahatT_ref[...]                               # (N, N)   A_hat^T
    w1hT = wslab_ref[pl.ds(R_W1H, H_HID), :]             # (32, 32) cols 26.. zero
    w2T = wslab_ref[pl.ds(R_W2, H_HID), :]               # (32, 32)
    w3T = wslab_ref[pl.ds(R_W3, H_HID), :]               # (32, 32) rows 26.. zero
    wfc3T = wslab_ref[pl.ds(R_FC3, H_HID), :]            # (32, 32) cols 26.. zero
    wfc4r = wslab_ref[pl.ds(R_FC4, 1), :]                # (1, 32)
    b_row = const_ref[0, pl.ds(0, 1), :]                 # (1, N)  boundary = y[0,:]
    bfc4row = const_ref[0, pl.ds(1, 1), :]               # (1, N)  fc4 bias row

    # --- step 0: res[0] = boundary; h = relu(fc2(relu(fc1(boundary)))) -------
    h0 = relu(const_ref[S_WFC1] * b_row + const_ref[S_BFC1])            # (32, N)
    h = relu(jnp.dot(wslab_ref[pl.ds(R_FC2, H_HID), :], h0,
                     preferred_element_type=f32) + const_ref[S_BFC2])   # (32, N)

    # --- steps 1..T-1 (fully unrolled: T is small & static) -----------------
    rows = [b_row]
    for i in range(1, T):
        # conv1: cat([h, x.repeat(1,3), t_i.repeat(N,3)], 1) @ W1 split as
        #   w1hT @ h  +  precomputed x/t contribution const[i].
        z1 = jnp.dot(w1hT, h, preferred_element_type=f32) + const_ref[i]
        h1 = relu(jnp.dot(z1, ahatT, preferred_element_type=f32) + const_ref[S_B1])
        # conv2
        z2 = jnp.dot(w2T, h1, preferred_element_type=f32)
        h2 = relu(jnp.dot(z2, ahatT, preferred_element_type=f32) + const_ref[S_B2])
        # conv3 (padded to 32 outputs; rows 26.. stay exactly zero)
        z3 = jnp.dot(w3T, h2, preferred_element_type=f32)
        h = relu(jnp.dot(z3, ahatT, preferred_element_type=f32) + const_ref[S_B3])
        # fc3 -> relu -> fc4 produces this step's lane-dense (1, N) output row.
        y = relu(jnp.dot(wfc3T, h, preferred_element_type=f32) + const_ref[S_BFC3])
        rows.append(jnp.dot(wfc4r, y, preferred_element_type=f32) + bfc4row)

    # --- deferred output: assemble all T rows and store exactly once ---------
    # (keeps the per-step partial stores out of the recurrence dependency chain)
    row_ids = jax.lax.broadcasted_iota(jnp.int32, (T, N), 0)
    out = jnp.zeros((T, N), f32)
    for i, r in enumerate(rows):
        out = jnp.where(row_ids == i, r, out)
    res_ref[...] = out


def _pad_to(a, shape):
    return jnp.pad(a, [(0, s - d) for d, s in zip(a.shape, shape)])


def net_rnn_forward(params, x, t, y0, a_hat):
    """x: (N,), t: (T,), y0 = data.y[0, :]: (N,), a_hat: (N, N) GCN-normalized adjacency."""
    Nn = x.shape[0]
    T = t.shape[0]
    f32 = jnp.float32

    def col_bcast(v, n):  # 1-D param -> zero-padded (n,) column -> (n, Nn) slab
        c = _pad_to(v.reshape(-1).astype(f32), (n,))
        return jnp.broadcast_to(c[:, None], (n, Nn))

    # ---- packed weight slab (168, 32): five transposed weights + fc4 row ----
    w1 = params["conv1_w"].astype(f32)                                  # (32, 32)
    w1hT = _pad_to(w1[:H_REC], (H_PAD, H_HID)).T                        # cols 26.. zero
    w2T = params["conv2_w"].astype(f32).T
    w3T = _pad_to(params["conv3_w"].astype(f32), (H_HID, H_PAD)).T      # rows 26.. zero
    wfc2T = _pad_to(params["fc2_w"].astype(f32), (H_HID, H_PAD)).T      # rows 26.. zero
    wfc3T = _pad_to(params["fc3_w"].astype(f32), (H_PAD, H_HID)).T      # cols 26.. zero
    wfc4r = params["fc4_w"].astype(f32).reshape(1, H_HID)
    wslab = jnp.concatenate(
        [w1hT, w2T, w3T, wfc2T, wfc3T, wfc4r,
         jnp.zeros((W_ROWS - 5 * H_HID - 1, H_HID), f32)], axis=0)      # (168, 32)

    # ---- packed const slab (T+7, 32, N) --------------------------------------
    #   slot 0      : row 0 = boundary y0, row 1 = fc4 bias (cin[0] is unused)
    #   slots 1..T-1: per-step conv1 x/t contribution, already transposed
    #   slots T..T+6: fc1 weight column and all biases, pre-broadcast to (32, N)
    w1x_col = jnp.sum(w1[H_REC:H_REC + 3], axis=0)[:, None]             # (32, 1)
    w1t_col = jnp.sum(w1[H_REC + 3:H_REC + 6], axis=0)[:, None]         # (32, 1)
    cin = (w1x_col * x.astype(f32)[None, :])[None, :, :] \
        + t.astype(f32)[:, None, None] * w1t_col[None, :, :]            # (T, 32, N)
    slot0 = jnp.zeros((H_HID, Nn), f32)
    slot0 = slot0.at[0].set(y0.reshape(-1).astype(f32))
    slot0 = slot0.at[1].set(params["fc4_b"].astype(f32)[0])
    const = jnp.concatenate(
        [cin.at[0].set(slot0),
         col_bcast(params["fc1_w"], H_HID)[None],     # S_WFC1
         col_bcast(params["fc1_b"], H_HID)[None],     # S_BFC1
         col_bcast(params["fc2_b"], H_PAD)[None],     # S_BFC2 (rows 26.. zero)
         col_bcast(params["conv1_b"], H_HID)[None],   # S_B1
         col_bcast(params["conv2_b"], H_HID)[None],   # S_B2
         col_bcast(params["conv3_b"], H_PAD)[None],   # S_B3   (rows 26.. zero)
         col_bcast(params["fc3_b"], H_HID)[None]],    # S_BFC3
        axis=0)                                                         # (T+7, 32, N)

    ahatT = a_hat.T.astype(f32)

    # Single grid-less invocation: 3 whole-array VMEM operands, one (T, N)
    # output written back to HBM once.
    res = pl.pallas_call(
        _rnn_kernel,
        out_shape=jax.ShapeDtypeStruct((T, Nn), f32),
    )(const, ahatT, wslab)
    return res.reshape(-1)


# ----------------------------- reference (pure JAX) -----------------------------
def reference_forward(params, x, t, boundary, a_hat):
    Nn = x.shape[0]
    T = t.shape[0]
    res = jnp.zeros((T, Nn), jnp.float32)
    res = res.at[0].set(boundary[:, 0])
    h0 = jax.nn.relu(boundary @ params["fc1_w"] + params["fc1_b"])
    h = jax.nn.relu(h0 @ params["fc2_w"] + params["fc2_b"])
    for i in range(1, T):
        x_i = jnp.tile(x, (1, 3))
        t_i = jnp.full((Nn, 3), t[i], jnp.float32)
        hin = jnp.concatenate([h, x_i, t_i], axis=1)
        h1 = jax.nn.relu(a_hat @ (hin @ params["conv1_w"]) + params["conv1_b"])
        h2 = jax.nn.relu(a_hat @ (h1 @ params["conv2_w"]) + params["conv2_b"])
        h = jax.nn.relu(a_hat @ (h2 @ params["conv3_w"]) + params["conv3_b"])
        y = jax.nn.relu(h @ params["fc3_w"] + params["fc3_b"])
        y = y @ params["fc4_w"] + params["fc4_b"]
        res = res.at[i].set(y[:, 0])
    return res.reshape(-1)


def build_gcn_norm_adj(src, dst, n):
    # GCNConv normalization: D^{-1/2} (A + I) D^{-1/2}
    A = jnp.zeros((n, n), jnp.float32).at[dst, src].add(1.0)
    A = A + jnp.eye(n, dtype=jnp.float32)
    deg = A.sum(axis=1)
    dinv = jax.lax.rsqrt(deg)
    return dinv[:, None] * A * dinv[None, :]


def init_params(key):
    def linear(k, fan_in, fan_out):
        k1, k2 = jax.random.split(k)
        bound = 1.0 / jnp.sqrt(jnp.float32(fan_in))
        w = jax.random.uniform(k1, (fan_in, fan_out), jnp.float32, -bound, bound)
        b = jax.random.uniform(k2, (fan_out,), jnp.float32, -bound, bound)
        return w, b

    keys = jax.random.split(key, 7)
    p = {}
    p["fc1_w"], p["fc1_b"] = linear(keys[0], 1, H_HID)
    p["fc2_w"], p["fc2_b"] = linear(keys[1], H_HID, H_REC)
    p["conv1_w"], p["conv1_b"] = linear(keys[2], H_HID, H_HID)
    p["conv2_w"], p["conv2_b"] = linear(keys[3], H_HID, H_HID)
    p["conv3_w"], p["conv3_b"] = linear(keys[4], H_HID, H_REC)
    p["fc3_w"], p["fc3_b"] = linear(keys[5], H_REC, H_HID)
    p["fc4_w"], p["fc4_b"] = linear(keys[6], H_HID, 1)
    return p


if __name__ == "__main__":
    key = jax.random.PRNGKey(0)
    kp, _ = jax.random.split(key)
    params = init_params(kp)

    Nn, T = 16, 8                                   # N spatial nodes, T time steps
    x = jnp.linspace(-1.0, 1.0, Nn, dtype=jnp.float32)       # data.x  spatial coords
    t = jnp.linspace(0.0, 1.0, T, dtype=jnp.float32)         # data.t  (T,)
    y0 = -jnp.sin(jnp.pi * x)                                # data.y[0, :] boundary (IC)

    # 1-D chain graph (spatial mesh), bidirectional edges
    src = jnp.concatenate([jnp.arange(Nn - 1), jnp.arange(1, Nn)])
    dst = jnp.concatenate([jnp.arange(1, Nn), jnp.arange(Nn - 1)])
    a_hat = build_gcn_norm_adj(src, dst, Nn)

    out = net_rnn_forward(params, x, t, y0, a_hat)
    out = jax.block_until_ready(out)

    ref = reference_forward(params, x.reshape(Nn, 1), t, y0.reshape(Nn, 1), a_hat)
    assert out.shape == (T * Nn,)
    if not jnp.allclose(out, ref, rtol=1e-3, atol=1e-3):
        raise AssertionError("Pallas kernel output does not match JAX reference")
    print("KERNEL_OK")
</pallas_src>

<mosaic_0001>
module attributes {stable_mosaic.version = 11 : i64} {
  func.func @_rnn_kernel(%arg0: memref<15x32x16xf32, #tpu.memory_space<vmem>>, %arg1: memref<16x16xf32, #tpu.memory_space<vmem>>, %arg2: memref<168x32xf32, #tpu.memory_space<vmem>>, %arg3: memref<8x16xf32, #tpu.memory_space<vmem>>) attributes {dimension_semantics = [], scalar_prefetch = 0 : i64, scratch_operands = 0 : i64, tpu.core_type = #tpu.core_type<tc>} {
    %c0 = arith.constant 0 : index
    %c0_0 = arith.constant 0 : index
    %0 = vector.load %arg1[%c0, %c0_0] : memref<16x16xf32, #tpu.memory_space<vmem>>, vector<16x16xf32>
    %c0_1 = arith.constant 0 : index
    %c0_2 = arith.constant 0 : index
    %1 = vector.load %arg2[%c0_1, %c0_2] : memref<168x32xf32, #tpu.memory_space<vmem>>, vector<32x32xf32>
    %c32 = arith.constant 32 : index
    %c0_3 = arith.constant 0 : index
    %2 = vector.load %arg2[%c32, %c0_3] : memref<168x32xf32, #tpu.memory_space<vmem>>, vector<32x32xf32>
    %c64 = arith.constant 64 : index
    %c0_4 = arith.constant 0 : index
    %3 = vector.load %arg2[%c64, %c0_4] : memref<168x32xf32, #tpu.memory_space<vmem>>, vector<32x32xf32>
    %c128 = arith.constant 128 : index
    %c0_5 = arith.constant 0 : index
    %4 = vector.load %arg2[%c128, %c0_5] : memref<168x32xf32, #tpu.memory_space<vmem>>, vector<32x32xf32>
    %c160 = arith.constant 160 : index
    %c0_6 = arith.constant 0 : index
    %5 = vector.load %arg2[%c160, %c0_6] : memref<168x32xf32, #tpu.memory_space<vmem>>, vector<1x32xf32>
    %c0_7 = arith.constant 0 : index
    %c0_8 = arith.constant 0 : index
    %c0_9 = arith.constant 0 : index
    %6 = vector.load %arg0[%c0_7, %c0_8, %c0_9] : memref<15x32x16xf32, #tpu.memory_space<vmem>>, vector<1x1x16xf32>
    %7 = vector.shape_cast %6 : vector<1x1x16xf32> to vector<1x16xf32>
    %c0_10 = arith.constant 0 : index
    %c1 = arith.constant 1 : index
    %c0_11 = arith.constant 0 : index
    %8 = vector.load %arg0[%c0_10, %c1, %c0_11] : memref<15x32x16xf32, #tpu.memory_space<vmem>>, vector<1x1x16xf32>
    %9 = vector.shape_cast %8 : vector<1x1x16xf32> to vector<1x16xf32>
    %c8 = arith.constant 8 : index
    %c0_12 = arith.constant 0 : index
    %c0_13 = arith.constant 0 : index
    %10 = vector.load %arg0[%c8, %c0_12, %c0_13] : memref<15x32x16xf32, #tpu.memory_space<vmem>>, vector<1x32x16xf32>
    %11 = vector.shape_cast %10 : vector<1x32x16xf32> to vector<32x16xf32>
    %12 = vector.broadcast %7 : vector<1x16xf32> to vector<32x16xf32>
    %13 = arith.mulf %11, %12 : vector<32x16xf32>
    %c9 = arith.constant 9 : index
    %c0_14 = arith.constant 0 : index
    %c0_15 = arith.constant 0 : index
    %14 = vector.load %arg0[%c9, %c0_14, %c0_15] : memref<15x32x16xf32, #tpu.memory_space<vmem>>, vector<1x32x16xf32>
    %15 = vector.shape_cast %14 : vector<1x32x16xf32> to vector<32x16xf32>
    %16 = arith.addf %13, %15 : vector<32x16xf32>
    %cst = arith.constant 0.000000e+00 : f32
    %17 = vector.broadcast %cst : f32 to vector<32x16xf32>
    %18 = arith.maximumf %16, %17 : vector<32x16xf32>
    %c96 = arith.constant 96 : index
    %c0_16 = arith.constant 0 : index
    %19 = vector.load %arg2[%c96, %c0_16] : memref<168x32xf32, #tpu.memory_space<vmem>>, vector<32x32xf32>
    %cst_17 = arith.constant dense<0.000000e+00> : vector<32x16xf32>
    %20 = tpu.matmul %19, %18, %cst_17 {dimension_numbers = #tpu.dot_dimension_numbers<[1], [0], [0], [1], [0, 0, 1, 1], [], []>} : vector<32x32xf32>, vector<32x16xf32>, vector<32x16xf32> -> vector<32x16xf32>
    %c10 = arith.constant 10 : index
    %c0_18 = arith.constant 0 : index
    %c0_19 = arith.constant 0 : index
    %21 = vector.load %arg0[%c10, %c0_18, %c0_19] : memref<15x32x16xf32, #tpu.memory_space<vmem>>, vector<1x32x16xf32>
    %22 = vector.shape_cast %21 : vector<1x32x16xf32> to vector<32x16xf32>
    %23 = arith.addf %20, %22 : vector<32x16xf32>
    %cst_20 = arith.constant 0.000000e+00 : f32
    %24 = vector.broadcast %cst_20 : f32 to vector<32x16xf32>
    %25 = arith.maximumf %23, %24 : vector<32x16xf32>
    %cst_21 = arith.constant dense<0.000000e+00> : vector<32x16xf32>
    %26 = tpu.matmul %1, %25, %cst_21 {dimension_numbers = #tpu.dot_dimension_numbers<[1], [0], [0], [1], [0, 0, 1, 1], [], []>} : vector<32x32xf32>, vector<32x16xf32>, vector<32x16xf32> -> vector<32x16xf32>
    %c1_22 = arith.constant 1 : index
    %c0_23 = arith.constant 0 : index
    %c0_24 = arith.constant 0 : index
    %27 = vector.load %arg0[%c1_22, %c0_23, %c0_24] : memref<15x32x16xf32, #tpu.memory_space<vmem>>, vector<1x32x16xf32>
    %28 = vector.shape_cast %27 : vector<1x32x16xf32> to vector<32x16xf32>
    %29 = arith.addf %26, %28 : vector<32x16xf32>
    %cst_25 = arith.constant dense<0.000000e+00> : vector<32x16xf32>
    %30 = tpu.matmul %29, %0, %cst_25 {dimension_numbers = #tpu.dot_dimension_numbers<[1], [0], [0], [1], [0, 0, 1, 1], [], []>} : vector<32x16xf32>, vector<16x16xf32>, vector<32x16xf32> -> vector<32x16xf32>
    %c11 = arith.constant 11 : index
    %c0_26 = arith.constant 0 : index
    %c0_27 = arith.constant 0 : index
    %31 = vector.load %arg0[%c11, %c0_26, %c0_27] : memref<15x32x16xf32, #tpu.memory_space<vmem>>, vector<1x32x16xf32>
    %32 = vector.shape_cast %31 : vector<1x32x16xf32> to vector<32x16xf32>
    %33 = arith.addf %30, %32 : vector<32x16xf32>
    %cst_28 = arith.constant 0.000000e+00 : f32
    %34 = vector.broadcast %cst_28 : f32 to vector<32x16xf32>
    %35 = arith.maximumf %33, %34 : vector<32x16xf32>
    %cst_29 = arith.constant dense<0.000000e+00> : vector<32x16xf32>
    %36 = tpu.matmul %2, %35, %cst_29 {dimension_numbers = #tpu.dot_dimension_numbers<[1], [0], [0], [1], [0, 0, 1, 1], [], []>} : vector<32x32xf32>, vector<32x16xf32>, vector<32x16xf32> -> vector<32x16xf32>
    %cst_30 = arith.constant dense<0.000000e+00> : vector<32x16xf32>
    %37 = tpu.matmul %36, %0, %cst_30 {dimension_numbers = #tpu.dot_dimension_numbers<[1], [0], [0], [1], [0, 0, 1, 1], [], []>} : vector<32x16xf32>, vector<16x16xf32>, vector<32x16xf32> -> vector<32x16xf32>
    %c12 = arith.constant 12 : index
    %c0_31 = arith.constant 0 : index
    %c0_32 = arith.constant 0 : index
    %38 = vector.load %arg0[%c12, %c0_31, %c0_32] : memref<15x32x16xf32, #tpu.memory_space<vmem>>, vector<1x32x16xf32>
    %39 = vector.shape_cast %38 : vector<1x32x16xf32> to vector<32x16xf32>
    %40 = arith.addf %37, %39 : vector<32x16xf32>
    %cst_33 = arith.constant 0.000000e+00 : f32
    %41 = vector.broadcast %cst_33 : f32 to vector<32x16xf32>
    %42 = arith.maximumf %40, %41 : vector<32x16xf32>
    %cst_34 = arith.constant dense<0.000000e+00> : vector<32x16xf32>
    %43 = tpu.matmul %3, %42, %cst_34 {dimension_numbers = #tpu.dot_dimension_numbers<[1], [0], [0], [1], [0, 0, 1, 1], [], []>} : vector<32x32xf32>, vector<32x16xf32>, vector<32x16xf32> -> vector<32x16xf32>
    %cst_35 = arith.constant dense<0.000000e+00> : vector<32x16xf32>
    %44 = tpu.matmul %43, %0, %cst_35 {dimension_numbers = #tpu.dot_dimension_numbers<[1], [0], [0], [1], [0, 0, 1, 1], [], []>} : vector<32x16xf32>, vector<16x16xf32>, vector<32x16xf32> -> vector<32x16xf32>
    %c13 = arith.constant 13 : index
    %c0_36 = arith.constant 0 : index
    %c0_37 = arith.constant 0 : index
    %45 = vector.load %arg0[%c13, %c0_36, %c0_37] : memref<15x32x16xf32, #tpu.memory_space<vmem>>, vector<1x32x16xf32>
    %46 = vector.shape_cast %45 : vector<1x32x16xf32> to vector<32x16xf32>
    %47 = arith.addf %44, %46 : vector<32x16xf32>
    %cst_38 = arith.constant 0.000000e+00 : f32
    %48 = vector.broadcast %cst_38 : f32 to vector<32x16xf32>
    %49 = arith.maximumf %47, %48 : vector<32x16xf32>
    %cst_39 = arith.constant dense<0.000000e+00> : vector<32x16xf32>
    %50 = tpu.matmul %4, %49, %cst_39 {dimension_numbers = #tpu.dot_dimension_numbers<[1], [0], [0], [1], [0, 0, 1, 1], [], []>} : vector<32x32xf32>, vector<32x16xf32>, vector<32x16xf32> -> vector<32x16xf32>
    %c14 = arith.constant 14 : index
    %c0_40 = arith.constant 0 : index
    %c0_41 = arith.constant 0 : index
    %51 = vector.load %arg0[%c14, %c0_40, %c0_41] : memref<15x32x16xf32, #tpu.memory_space<vmem>>, vector<1x32x16xf32>
    %52 = vector.shape_cast %51 : vector<1x32x16xf32> to vector<32x16xf32>
    %53 = arith.addf %50, %52 : vector<32x16xf32>
    %cst_42 = arith.constant 0.000000e+00 : f32
    %54 = vector.broadcast %cst_42 : f32 to vector<32x16xf32>
    %55 = arith.maximumf %53, %54 : vector<32x16xf32>
    %cst_43 = arith.constant dense<0.000000e+00> : vector<1x16xf32>
    %56 = tpu.matmul %5, %55, %cst_43 {dimension_numbers = #tpu.dot_dimension_numbers<[1], [0], [0], [1], [0, 0, 1, 1], [], []>} : vector<1x32xf32>, vector<32x16xf32>, vector<1x16xf32> -> vector<1x16xf32>
    %57 = arith.addf %56, %9 : vector<1x16xf32>
    %cst_44 = arith.constant dense<0.000000e+00> : vector<32x16xf32>
    %58 = tpu.matmul %1, %49, %cst_44 {dimension_numbers = #tpu.dot_dimension_numbers<[1], [0], [0], [1], [0, 0, 1, 1], [], []>} : vector<32x32xf32>, vector<32x16xf32>, vector<32x16xf32> -> vector<32x16xf32>
    %c2 = arith.constant 2 : index
    %c0_45 = arith.constant 0 : index
    %c0_46 = arith.constant 0 : index
    %59 = vector.load %arg0[%c2, %c0_45, %c0_46] : memref<15x32x16xf32, #tpu.memory_space<vmem>>, vector<1x32x16xf32>
    %60 = vector.shape_cast %59 : vector<1x32x16xf32> to vector<32x16xf32>
    %61 = arith.addf %58, %60 : vector<32x16xf32>
    %cst_47 = arith.constant dense<0.000000e+00> : vector<32x16xf32>
    %62 = tpu.matmul %61, %0, %cst_47 {dimension_numbers = #tpu.dot_dimension_numbers<[1], [0], [0], [1], [0, 0, 1, 1], [], []>} : vector<32x16xf32>, vector<16x16xf32>, vector<32x16xf32> -> vector<32x16xf32>
    %c11_48 = arith.constant 11 : index
    %c0_49 = arith.constant 0 : index
    %c0_50 = arith.constant 0 : index
    %63 = vector.load %arg0[%c11_48, %c0_49, %c0_50] : memref<15x32x16xf32, #tpu.memory_space<vmem>>, vector<1x32x16xf32>
    %64 = vector.shape_cast %63 : vector<1x32x16xf32> to vector<32x16xf32>
    %65 = arith.addf %62, %64 : vector<32x16xf32>
    %cst_51 = arith.constant 0.000000e+00 : f32
    %66 = vector.broadcast %cst_51 : f32 to vector<32x16xf32>
    %67 = arith.maximumf %65, %66 : vector<32x16xf32>
    %cst_52 = arith.constant dense<0.000000e+00> : vector<32x16xf32>
    %68 = tpu.matmul %2, %67, %cst_52 {dimension_numbers = #tpu.dot_dimension_numbers<[1], [0], [0], [1], [0, 0, 1, 1], [], []>} : vector<32x32xf32>, vector<32x16xf32>, vector<32x16xf32> -> vector<32x16xf32>
    %cst_53 = arith.constant dense<0.000000e+00> : vector<32x16xf32>
    %69 = tpu.matmul %68, %0, %cst_53 {dimension_numbers = #tpu.dot_dimension_numbers<[1], [0], [0], [1], [0, 0, 1, 1], [], []>} : vector<32x16xf32>, vector<16x16xf32>, vector<32x16xf32> -> vector<32x16xf32>
    %c12_54 = arith.constant 12 : index
    %c0_55 = arith.constant 0 : index
    %c0_56 = arith.constant 0 : index
    %70 = vector.load %arg0[%c12_54, %c0_55, %c0_56] : memref<15x32x16xf32, #tpu.memory_space<vmem>>, vector<1x32x16xf32>
    %71 = vector.shape_cast %70 : vector<1x32x16xf32> to vector<32x16xf32>
    %72 = arith.addf %69, %71 : vector<32x16xf32>
    %cst_57 = arith.constant 0.000000e+00 : f32
    %73 = vector.broadcast %cst_57 : f32 to vector<32x16xf32>
    %74 = arith.maximumf %72, %73 : vector<32x16xf32>
    %cst_58 = arith.constant dense<0.000000e+00> : vector<32x16xf32>
    %75 = tpu.matmul %3, %74, %cst_58 {dimension_numbers = #tpu.dot_dimension_numbers<[1], [0], [0], [1], [0, 0, 1, 1], [], []>} : vector<32x32xf32>, vector<32x16xf32>, vector<32x16xf32> -> vector<32x16xf32>
    %cst_59 = arith.constant dense<0.000000e+00> : vector<32x16xf32>
    %76 = tpu.matmul %75, %0, %cst_59 {dimension_numbers = #tpu.dot_dimension_numbers<[1], [0], [0], [1], [0, 0, 1, 1], [], []>} : vector<32x16xf32>, vector<16x16xf32>, vector<32x16xf32> -> vector<32x16xf32>
    %c13_60 = arith.constant 13 : index
    %c0_61 = arith.constant 0 : index
    %c0_62 = arith.constant 0 : index
    %77 = vector.load %arg0[%c13_60, %c0_61, %c0_62] : memref<15x32x16xf32, #tpu.memory_space<vmem>>, vector<1x32x16xf32>
    %78 = vector.shape_cast %77 : vector<1x32x16xf32> to vector<32x16xf32>
    %79 = arith.addf %76, %78 : vector<32x16xf32>
    %cst_63 = arith.constant 0.000000e+00 : f32
    %80 = vector.broadcast %cst_63 : f32 to vector<32x16xf32>
    %81 = arith.maximumf %79, %80 : vector<32x16xf32>
    %cst_64 = arith.constant dense<0.000000e+00> : vector<32x16xf32>
    %82 = tpu.matmul %4, %81, %cst_64 {dimension_numbers = #tpu.dot_dimension_numbers<[1], [0], [0], [1], [0, 0, 1, 1], [], []>} : vector<32x32xf32>, vector<32x16xf32>, vector<32x16xf32> -> vector<32x16xf32>
    %c14_65 = arith.constant 14 : index
    %c0_66 = arith.constant 0 : index
    %c0_67 = arith.constant 0 : index
    %83 = vector.load %arg0[%c14_65, %c0_66, %c0_67] : memref<15x32x16xf32, #tpu.memory_space<vmem>>, vector<1x32x16xf32>
    %84 = vector.shape_cast %83 : vector<1x32x16xf32> to vector<32x16xf32>
    %85 = arith.addf %82, %84 : vector<32x16xf32>
    %cst_68 = arith.constant 0.000000e+00 : f32
    %86 = vector.broadcast %cst_68 : f32 to vector<32x16xf32>
    %87 = arith.maximumf %85, %86 : vector<32x16xf32>
    %cst_69 = arith.constant dense<0.000000e+00> : vector<1x16xf32>
    %88 = tpu.matmul %5, %87, %cst_69 {dimension_numbers = #tpu.dot_dimension_numbers<[1], [0], [0], [1], [0, 0, 1, 1], [], []>} : vector<1x32xf32>, vector<32x16xf32>, vector<1x16xf32> -> vector<1x16xf32>
    %89 = arith.addf %88, %9 : vector<1x16xf32>
    %cst_70 = arith.constant dense<0.000000e+00> : vector<32x16xf32>
    %90 = tpu.matmul %1, %81, %cst_70 {dimension_numbers = #tpu.dot_dimension_numbers<[1], [0], [0], [1], [0, 0, 1, 1], [], []>} : vector<32x32xf32>, vector<32x16xf32>, vector<32x16xf32> -> vector<32x16xf32>
    %c3 = arith.constant 3 : index
    %c0_71 = arith.constant 0 : index
    %c0_72 = arith.constant 0 : index
    %91 = vector.load %arg0[%c3, %c0_71, %c0_72] : memref<15x32x16xf32, #tpu.memory_space<vmem>>, vector<1x32x16xf32>
    %92 = vector.shape_cast %91 : vector<1x32x16xf32> to vector<32x16xf32>
    %93 = arith.addf %90, %92 : vector<32x16xf32>
    %cst_73 = arith.constant dense<0.000000e+00> : vector<32x16xf32>
    %94 = tpu.matmul %93, %0, %cst_73 {dimension_numbers = #tpu.dot_dimension_numbers<[1], [0], [0], [1], [0, 0, 1, 1], [], []>} : vector<32x16xf32>, vector<16x16xf32>, vector<32x16xf32> -> vector<32x16xf32>
    %c11_74 = arith.constant 11 : index
    %c0_75 = arith.constant 0 : index
    %c0_76 = arith.constant 0 : index
    %95 = vector.load %arg0[%c11_74, %c0_75, %c0_76] : memref<15x32x16xf32, #tpu.memory_space<vmem>>, vector<1x32x16xf32>
    %96 = vector.shape_cast %95 : vector<1x32x16xf32> to vector<32x16xf32>
    %97 = arith.addf %94, %96 : vector<32x16xf32>
    %cst_77 = arith.constant 0.000000e+00 : f32
    %98 = vector.broadcast %cst_77 : f32 to vector<32x16xf32>
    %99 = arith.maximumf %97, %98 : vector<32x16xf32>
    %cst_78 = arith.constant dense<0.000000e+00> : vector<32x16xf32>
    %100 = tpu.matmul %2, %99, %cst_78 {dimension_numbers = #tpu.dot_dimension_numbers<[1], [0], [0], [1], [0, 0, 1, 1], [], []>} : vector<32x32xf32>, vector<32x16xf32>, vector<32x16xf32> -> vector<32x16xf32>
    %cst_79 = arith.constant dense<0.000000e+00> : vector<32x16xf32>
    %101 = tpu.matmul %100, %0, %cst_79 {dimension_numbers = #tpu.dot_dimension_numbers<[1], [0], [0], [1], [0, 0, 1, 1], [], []>} : vector<32x16xf32>, vector<16x16xf32>, vector<32x16xf32> -> vector<32x16xf32>
    %c12_80 = arith.constant 12 : index
    %c0_81 = arith.constant 0 : index
    %c0_82 = arith.constant 0 : index
    %102 = vector.load %arg0[%c12_80, %c0_81, %c0_82] : memref<15x32x16xf32, #tpu.memory_space<vmem>>, vector<1x32x16xf32>
    %103 = vector.shape_cast %102 : vector<1x32x16xf32> to vector<32x16xf32>
    %104 = arith.addf %101, %103 : vector<32x16xf32>
    %cst_83 = arith.constant 0.000000e+00 : f32
    %105 = vector.broadcast %cst_83 : f32 to vector<32x16xf32>
    %106 = arith.maximumf %104, %105 : vector<32x16xf32>
    %cst_84 = arith.constant dense<0.000000e+00> : vector<32x16xf32>
    %107 = tpu.matmul %3, %106, %cst_84 {dimension_numbers = #tpu.dot_dimension_numbers<[1], [0], [0], [1], [0, 0, 1, 1], [], []>} : vector<32x32xf32>, vector<32x16xf32>, vector<32x16xf32> -> vector<32x16xf32>
    %cst_85 = arith.constant dense<0.000000e+00> : vector<32x16xf32>
    %108 = tpu.matmul %107, %0, %cst_85 {dimension_numbers = #tpu.dot_dimension_numbers<[1], [0], [0], [1], [0, 0, 1, 1], [], []>} : vector<32x16xf32>, vector<16x16xf32>, vector<32x16xf32> -> vector<32x16xf32>
    %c13_86 = arith.constant 13 : index
    %c0_87 = arith.constant 0 : index
    %c0_88 = arith.constant 0 : index
    %109 = vector.load %arg0[%c13_86, %c0_87, %c0_88] : memref<15x32x16xf32, #tpu.memory_space<vmem>>, vector<1x32x16xf32>
    %110 = vector.shape_cast %109 : vector<1x32x16xf32> to vector<32x16xf32>
    %111 = arith.addf %108, %110 : vector<32x16xf32>
    %cst_89 = arith.constant 0.000000e+00 : f32
    %112 = vector.broadcast %cst_89 : f32 to vector<32x16xf32>
    %113 = arith.maximumf %111, %112 : vector<32x16xf32>
    %cst_90 = arith.constant dense<0.000000e+00> : vector<32x16xf32>
    %114 = tpu.matmul %4, %113, %cst_90 {dimension_numbers = #tpu.dot_dimension_numbers<[1], [0], [0], [1], [0, 0, 1, 1], [], []>} : vector<32x32xf32>, vector<32x16xf32>, vector<32x16xf32> -> vector<32x16xf32>
    %c14_91 = arith.constant 14 : index
    %c0_92 = arith.constant 0 : index
    %c0_93 = arith.constant 0 : index
    %115 = vector.load %arg0[%c14_91, %c0_92, %c0_93] : memref<15x32x16xf32, #tpu.memory_space<vmem>>, vector<1x32x16xf32>
    %116 = vector.shape_cast %115 : vector<1x32x16xf32> to vector<32x16xf32>
    %117 = arith.addf %114, %116 : vector<32x16xf32>
    %cst_94 = arith.constant 0.000000e+00 : f32
    %118 = vector.broadcast %cst_94 : f32 to vector<32x16xf32>
    %119 = arith.maximumf %117, %118 : vector<32x16xf32>
    %cst_95 = arith.constant dense<0.000000e+00> : vector<1x16xf32>
    %120 = tpu.matmul %5, %119, %cst_95 {dimension_numbers = #tpu.dot_dimension_numbers<[1], [0], [0], [1], [0, 0, 1, 1], [], []>} : vector<1x32xf32>, vector<32x16xf32>, vector<1x16xf32> -> vector<1x16xf32>
    %121 = arith.addf %120, %9 : vector<1x16xf32>
    %cst_96 = arith.constant dense<0.000000e+00> : vector<32x16xf32>
    %122 = tpu.matmul %1, %113, %cst_96 {dimension_numbers = #tpu.dot_dimension_numbers<[1], [0], [0], [1], [0, 0, 1, 1], [], []>} : vector<32x32xf32>, vector<32x16xf32>, vector<32x16xf32> -> vector<32x16xf32>
    %c4 = arith.constant 4 : index
    %c0_97 = arith.constant 0 : index
    %c0_98 = arith.constant 0 : index
    %123 = vector.load %arg0[%c4, %c0_97, %c0_98] : memref<15x32x16xf32, #tpu.memory_space<vmem>>, vector<1x32x16xf32>
    %124 = vector.shape_cast %123 : vector<1x32x16xf32> to vector<32x16xf32>
    %125 = arith.addf %122, %124 : vector<32x16xf32>
    %cst_99 = arith.constant dense<0.000000e+00> : vector<32x16xf32>
    %126 = tpu.matmul %125, %0, %cst_99 {dimension_numbers = #tpu.dot_dimension_numbers<[1], [0], [0], [1], [0, 0, 1, 1], [], []>} : vector<32x16xf32>, vector<16x16xf32>, vector<32x16xf32> -> vector<32x16xf32>
    %c11_100 = arith.constant 11 : index
    %c0_101 = arith.constant 0 : index
    %c0_102 = arith.constant 0 : index
    %127 = vector.load %arg0[%c11_100, %c0_101, %c0_102] : memref<15x32x16xf32, #tpu.memory_space<vmem>>, vector<1x32x16xf32>
    %128 = vector.shape_cast %127 : vector<1x32x16xf32> to vector<32x16xf32>
    %129 = arith.addf %126, %128 : vector<32x16xf32>
    %cst_103 = arith.constant 0.000000e+00 : f32
    %130 = vector.broadcast %cst_103 : f32 to vector<32x16xf32>
    %131 = arith.maximumf %129, %130 : vector<32x16xf32>
    %cst_104 = arith.constant dense<0.000000e+00> : vector<32x16xf32>
    %132 = tpu.matmul %2, %131, %cst_104 {dimension_numbers = #tpu.dot_dimension_numbers<[1], [0], [0], [1], [0, 0, 1, 1], [], []>} : vector<32x32xf32>, vector<32x16xf32>, vector<32x16xf32> -> vector<32x16xf32>
    %cst_105 = arith.constant dense<0.000000e+00> : vector<32x16xf32>
    %133 = tpu.matmul %132, %0, %cst_105 {dimension_numbers = #tpu.dot_dimension_numbers<[1], [0], [0], [1], [0, 0, 1, 1], [], []>} : vector<32x16xf32>, vector<16x16xf32>, vector<32x16xf32> -> vector<32x16xf32>
    %c12_106 = arith.constant 12 : index
    %c0_107 = arith.constant 0 : index
    %c0_108 = arith.constant 0 : index
    %134 = vector.load %arg0[%c12_106, %c0_107, %c0_108] : memref<15x32x16xf32, #tpu.memory_space<vmem>>, vector<1x32x16xf32>
    %135 = vector.shape_cast %134 : vector<1x32x16xf32> to vector<32x16xf32>
    %136 = arith.addf %133, %135 : vector<32x16xf32>
    %cst_109 = arith.constant 0.000000e+00 : f32
    %137 = vector.broadcast %cst_109 : f32 to vector<32x16xf32>
    %138 = arith.maximumf %136, %137 : vector<32x16xf32>
    %cst_110 = arith.constant dense<0.000000e+00> : vector<32x16xf32>
    %139 = tpu.matmul %3, %138, %cst_110 {dimension_numbers = #tpu.dot_dimension_numbers<[1], [0], [0], [1], [0, 0, 1, 1], [], []>} : vector<32x32xf32>, vector<32x16xf32>, vector<32x16xf32> -> vector<32x16xf32>
    %cst_111 = arith.constant dense<0.000000e+00> : vector<32x16xf32>
    %140 = tpu.matmul %139, %0, %cst_111 {dimension_numbers = #tpu.dot_dimension_numbers<[1], [0], [0], [1], [0, 0, 1, 1], [], []>} : vector<32x16xf32>, vector<16x16xf32>, vector<32x16xf32> -> vector<32x16xf32>
    %c13_112 = arith.constant 13 : index
    %c0_113 = arith.constant 0 : index
    %c0_114 = arith.constant 0 : index
    %141 = vector.load %arg0[%c13_112, %c0_113, %c0_114] : memref<15x32x16xf32, #tpu.memory_space<vmem>>, vector<1x32x16xf32>
    %142 = vector.shape_cast %141 : vector<1x32x16xf32> to vector<32x16xf32>
    %143 = arith.addf %140, %142 : vector<32x16xf32>
    %cst_115 = arith.constant 0.000000e+00 : f32
    %144 = vector.broadcast %cst_115 : f32 to vector<32x16xf32>
    %145 = arith.maximumf %143, %144 : vector<32x16xf32>
    %cst_116 = arith.constant dense<0.000000e+00> : vector<32x16xf32>
    %146 = tpu.matmul %4, %145, %cst_116 {dimension_numbers = #tpu.dot_dimension_numbers<[1], [0], [0], [1], [0, 0, 1, 1], [], []>} : vector<32x32xf32>, vector<32x16xf32>, vector<32x16xf32> -> vector<32x16xf32>
    %c14_117 = arith.constant 14 : index
    %c0_118 = arith.constant 0 : index
    %c0_119 = arith.constant 0 : index
    %147 = vector.load %arg0[%c14_117, %c0_118, %c0_119] : memref<15x32x16xf32, #tpu.memory_space<vmem>>, vector<1x32x16xf32>
    %148 = vector.shape_cast %147 : vector<1x32x16xf32> to vector<32x16xf32>
    %149 = arith.addf %146, %148 : vector<32x16xf32>
    %cst_120 = arith.constant 0.000000e+00 : f32
    %150 = vector.broadcast %cst_120 : f32 to vector<32x16xf32>
    %151 = arith.maximumf %149, %150 : vector<32x16xf32>
    %cst_121 = arith.constant dense<0.000000e+00> : vector<1x16xf32>
    %152 = tpu.matmul %5, %151, %cst_121 {dimension_numbers = #tpu.dot_dimension_numbers<[1], [0], [0], [1], [0, 0, 1, 1], [], []>} : vector<1x32xf32>, vector<32x16xf32>, vector<1x16xf32> -> vector<1x16xf32>
    %153 = arith.addf %152, %9 : vector<1x16xf32>
    %cst_122 = arith.constant dense<0.000000e+00> : vector<32x16xf32>
    %154 = tpu.matmul %1, %145, %cst_122 {dimension_numbers = #tpu.dot_dimension_numbers<[1], [0], [0], [1], [0, 0, 1, 1], [], []>} : vector<32x32xf32>, vector<32x16xf32>, vector<32x16xf32> -> vector<32x16xf32>
    %c5 = arith.constant 5 : index
    %c0_123 = arith.constant 0 : index
    %c0_124 = arith.constant 0 : index
    %155 = vector.load %arg0[%c5, %c0_123, %c0_124] : memref<15x32x16xf32, #tpu.memory_space<vmem>>, vector<1x32x16xf32>
    %156 = vector.shape_cast %155 : vector<1x32x16xf32> to vector<32x16xf32>
    %157 = arith.addf %154, %156 : vector<32x16xf32>
    %cst_125 = arith.constant dense<0.000000e+00> : vector<32x16xf32>
    %158 = tpu.matmul %157, %0, %cst_125 {dimension_numbers = #tpu.dot_dimension_numbers<[1], [0], [0], [1], [0, 0, 1, 1], [], []>} : vector<32x16xf32>, vector<16x16xf32>, vector<32x16xf32> -> vector<32x16xf32>
    %c11_126 = arith.constant 11 : index
    %c0_127 = arith.constant 0 : index
    %c0_128 = arith.constant 0 : index
    %159 = vector.load %arg0[%c11_126, %c0_127, %c0_128] : memref<15x32x16xf32, #tpu.memory_space<vmem>>, vector<1x32x16xf32>
    %160 = vector.shape_cast %159 : vector<1x32x16xf32> to vector<32x16xf32>
    %161 = arith.addf %158, %160 : vector<32x16xf32>
    %cst_129 = arith.constant 0.000000e+00 : f32
    %162 = vector.broadcast %cst_129 : f32 to vector<32x16xf32>
    %163 = arith.maximumf %161, %162 : vector<32x16xf32>
    %cst_130 = arith.constant dense<0.000000e+00> : vector<32x16xf32>
    %164 = tpu.matmul %2, %163, %cst_130 {dimension_numbers = #tpu.dot_dimension_numbers<[1], [0], [0], [1], [0, 0, 1, 1], [], []>} : vector<32x32xf32>, vector<32x16xf32>, vector<32x16xf32> -> vector<32x16xf32>
    %cst_131 = arith.constant dense<0.000000e+00> : vector<32x16xf32>
    %165 = tpu.matmul %164, %0, %cst_131 {dimension_numbers = #tpu.dot_dimension_numbers<[1], [0], [0], [1], [0, 0, 1, 1], [], []>} : vector<32x16xf32>, vector<16x16xf32>, vector<32x16xf32> -> vector<32x16xf32>
    %c12_132 = arith.constant 12 : index
    %c0_133 = arith.constant 0 : index
    %c0_134 = arith.constant 0 : index
    %166 = vector.load %arg0[%c12_132, %c0_133, %c0_134] : memref<15x32x16xf32, #tpu.memory_space<vmem>>, vector<1x32x16xf32>
    %167 = vector.shape_cast %166 : vector<1x32x16xf32> to vector<32x16xf32>
    %168 = arith.addf %165, %167 : vector<32x16xf32>
    %cst_135 = arith.constant 0.000000e+00 : f32
    %169 = vector.broadcast %cst_135 : f32 to vector<32x16xf32>
    %170 = arith.maximumf %168, %169 : vector<32x16xf32>
    %cst_136 = arith.constant dense<0.000000e+00> : vector<32x16xf32>
    %171 = tpu.matmul %3, %170, %cst_136 {dimension_numbers = #tpu.dot_dimension_numbers<[1], [0], [0], [1], [0, 0, 1, 1], [], []>} : vector<32x32xf32>, vector<32x16xf32>, vector<32x16xf32> -> vector<32x16xf32>
    %cst_137 = arith.constant dense<0.000000e+00> : vector<32x16xf32>
    %172 = tpu.matmul %171, %0, %cst_137 {dimension_numbers = #tpu.dot_dimension_numbers<[1], [0], [0], [1], [0, 0, 1, 1], [], []>} : vector<32x16xf32>, vector<16x16xf32>, vector<32x16xf32> -> vector<32x16xf32>
    %c13_138 = arith.constant 13 : index
    %c0_139 = arith.constant 0 : index
    %c0_140 = arith.constant 0 : index
    %173 = vector.load %arg0[%c13_138, %c0_139, %c0_140] : memref<15x32x16xf32, #tpu.memory_space<vmem>>, vector<1x32x16xf32>
    %174 = vector.shape_cast %173 : vector<1x32x16xf32> to vector<32x16xf32>
    %175 = arith.addf %172, %174 : vector<32x16xf32>
    %cst_141 = arith.constant 0.000000e+00 : f32
    %176 = vector.broadcast %cst_141 : f32 to vector<32x16xf32>
    %177 = arith.maximumf %175, %176 : vector<32x16xf32>
    %cst_142 = arith.constant dense<0.000000e+00> : vector<32x16xf32>
    %178 = tpu.matmul %4, %177, %cst_142 {dimension_numbers = #tpu.dot_dimension_numbers<[1], [0], [0], [1], [0, 0, 1, 1], [], []>} : vector<32x32xf32>, vector<32x16xf32>, vector<32x16xf32> -> vector<32x16xf32>
    %c14_143 = arith.constant 14 : index
    %c0_144 = arith.constant 0 : index
    %c0_145 = arith.constant 0 : index
    %179 = vector.load %arg0[%c14_143, %c0_144, %c0_145] : memref<15x32x16xf32, #tpu.memory_space<vmem>>, vector<1x32x16xf32>
    %180 = vector.shape_cast %179 : vector<1x32x16xf32> to vector<32x16xf32>
    %181 = arith.addf %178, %180 : vector<32x16xf32>
    %cst_146 = arith.constant 0.000000e+00 : f32
    %182 = vector.broadcast %cst_146 : f32 to vector<32x16xf32>
    %183 = arith.maximumf %181, %182 : vector<32x16xf32>
    %cst_147 = arith.constant dense<0.000000e+00> : vector<1x16xf32>
    %184 = tpu.matmul %5, %183, %cst_147 {dimension_numbers = #tpu.dot_dimension_numbers<[1], [0], [0], [1], [0, 0, 1, 1], [], []>} : vector<1x32xf32>, vector<32x16xf32>, vector<1x16xf32> -> vector<1x16xf32>
    %185 = arith.addf %184, %9 : vector<1x16xf32>
    %cst_148 = arith.constant dense<0.000000e+00> : vector<32x16xf32>
    %186 = tpu.matmul %1, %177, %cst_148 {dimension_numbers = #tpu.dot_dimension_numbers<[1], [0], [0], [1], [0, 0, 1, 1], [], []>} : vector<32x32xf32>, vector<32x16xf32>, vector<32x16xf32> -> vector<32x16xf32>
    %c6 = arith.constant 6 : index
    %c0_149 = arith.constant 0 : index
    %c0_150 = arith.constant 0 : index
    %187 = vector.load %arg0[%c6, %c0_149, %c0_150] : memref<15x32x16xf32, #tpu.memory_space<vmem>>, vector<1x32x16xf32>
    %188 = vector.shape_cast %187 : vector<1x32x16xf32> to vector<32x16xf32>
    %189 = arith.addf %186, %188 : vector<32x16xf32>
    %cst_151 = arith.constant dense<0.000000e+00> : vector<32x16xf32>
    %190 = tpu.matmul %189, %0, %cst_151 {dimension_numbers = #tpu.dot_dimension_numbers<[1], [0], [0], [1], [0, 0, 1, 1], [], []>} : vector<32x16xf32>, vector<16x16xf32>, vector<32x16xf32> -> vector<32x16xf32>
    %c11_152 = arith.constant 11 : index
    %c0_153 = arith.constant 0 : index
    %c0_154 = arith.constant 0 : index
    %191 = vector.load %arg0[%c11_152, %c0_153, %c0_154] : memref<15x32x16xf32, #tpu.memory_space<vmem>>, vector<1x32x16xf32>
    %192 = vector.shape_cast %191 : vector<1x32x16xf32> to vector<32x16xf32>
    %193 = arith.addf %190, %192 : vector<32x16xf32>
    %cst_155 = arith.constant 0.000000e+00 : f32
    %194 = vector.broadcast %cst_155 : f32 to vector<32x16xf32>
    %195 = arith.maximumf %193, %194 : vector<32x16xf32>
    %cst_156 = arith.constant dense<0.000000e+00> : vector<32x16xf32>
    %196 = tpu.matmul %2, %195, %cst_156 {dimension_numbers = #tpu.dot_dimension_numbers<[1], [0], [0], [1], [0, 0, 1, 1], [], []>} : vector<32x32xf32>, vector<32x16xf32>, vector<32x16xf32> -> vector<32x16xf32>
    %cst_157 = arith.constant dense<0.000000e+00> : vector<32x16xf32>
    %197 = tpu.matmul %196, %0, %cst_157 {dimension_numbers = #tpu.dot_dimension_numbers<[1], [0], [0], [1], [0, 0, 1, 1], [], []>} : vector<32x16xf32>, vector<16x16xf32>, vector<32x16xf32> -> vector<32x16xf32>
    %c12_158 = arith.constant 12 : index
    %c0_159 = arith.constant 0 : index
    %c0_160 = arith.constant 0 : index
    %198 = vector.load %arg0[%c12_158, %c0_159, %c0_160] : memref<15x32x16xf32, #tpu.memory_space<vmem>>, vector<1x32x16xf32>
    %199 = vector.shape_cast %198 : vector<1x32x16xf32> to vector<32x16xf32>
    %200 = arith.addf %197, %199 : vector<32x16xf32>
    %cst_161 = arith.constant 0.000000e+00 : f32
    %201 = vector.broadcast %cst_161 : f32 to vector<32x16xf32>
    %202 = arith.maximumf %200, %201 : vector<32x16xf32>
    %cst_162 = arith.constant dense<0.000000e+00> : vector<32x16xf32>
    %203 = tpu.matmul %3, %202, %cst_162 {dimension_numbers = #tpu.dot_dimension_numbers<[1], [0], [0], [1], [0, 0, 1, 1], [], []>} : vector<32x32xf32>, vector<32x16xf32>, vector<32x16xf32> -> vector<32x16xf32>
    %cst_163 = arith.constant dense<0.000000e+00> : vector<32x16xf32>
    %204 = tpu.matmul %203, %0, %cst_163 {dimension_numbers = #tpu.dot_dimension_numbers<[1], [0], [0], [1], [0, 0, 1, 1], [], []>} : vector<32x16xf32>, vector<16x16xf32>, vector<32x16xf32> -> vector<32x16xf32>
    %c13_164 = arith.constant 13 : index
    %c0_165 = arith.constant 0 : index
    %c0_166 = arith.constant 0 : index
    %205 = vector.load %arg0[%c13_164, %c0_165, %c0_166] : memref<15x32x16xf32, #tpu.memory_space<vmem>>, vector<1x32x16xf32>
    %206 = vector.shape_cast %205 : vector<1x32x16xf32> to vector<32x16xf32>
    %207 = arith.addf %204, %206 : vector<32x16xf32>
    %cst_167 = arith.constant 0.000000e+00 : f32
    %208 = vector.broadcast %cst_167 : f32 to vector<32x16xf32>
    %209 = arith.maximumf %207, %208 : vector<32x16xf32>
    %cst_168 = arith.constant dense<0.000000e+00> : vector<32x16xf32>
    %210 = tpu.matmul %4, %209, %cst_168 {dimension_numbers = #tpu.dot_dimension_numbers<[1], [0], [0], [1], [0, 0, 1, 1], [], []>} : vector<32x32xf32>, vector<32x16xf32>, vector<32x16xf32> -> vector<32x16xf32>
    %c14_169 = arith.constant 14 : index
    %c0_170 = arith.constant 0 : index
    %c0_171 = arith.constant 0 : index
    %211 = vector.load %arg0[%c14_169, %c0_170, %c0_171] : memref<15x32x16xf32, #tpu.memory_space<vmem>>, vector<1x32x16xf32>
    %212 = vector.shape_cast %211 : vector<1x32x16xf32> to vector<32x16xf32>
    %213 = arith.addf %210, %212 : vector<32x16xf32>
    %cst_172 = arith.constant 0.000000e+00 : f32
    %214 = vector.broadcast %cst_172 : f32 to vector<32x16xf32>
    %215 = arith.maximumf %213, %214 : vector<32x16xf32>
    %cst_173 = arith.constant dense<0.000000e+00> : vector<1x16xf32>
    %216 = tpu.matmul %5, %215, %cst_173 {dimension_numbers = #tpu.dot_dimension_numbers<[1], [0], [0], [1], [0, 0, 1, 1], [], []>} : vector<1x32xf32>, vector<32x16xf32>, vector<1x16xf32> -> vector<1x16xf32>
    %217 = arith.addf %216, %9 : vector<1x16xf32>
    %cst_174 = arith.constant dense<0.000000e+00> : vector<32x16xf32>
    %218 = tpu.matmul %1, %209, %cst_174 {dimension_numbers = #tpu.dot_dimension_numbers<[1], [0], [0], [1], [0, 0, 1, 1], [], []>} : vector<32x32xf32>, vector<32x16xf32>, vector<32x16xf32> -> vector<32x16xf32>
    %c7 = arith.constant 7 : index
    %c0_175 = arith.constant 0 : index
    %c0_176 = arith.constant 0 : index
    %219 = vector.load %arg0[%c7, %c0_175, %c0_176] : memref<15x32x16xf32, #tpu.memory_space<vmem>>, vector<1x32x16xf32>
    %220 = vector.shape_cast %219 : vector<1x32x16xf32> to vector<32x16xf32>
    %221 = arith.addf %218, %220 : vector<32x16xf32>
    %cst_177 = arith.constant dense<0.000000e+00> : vector<32x16xf32>
    %222 = tpu.matmul %221, %0, %cst_177 {dimension_numbers = #tpu.dot_dimension_numbers<[1], [0], [0], [1], [0, 0, 1, 1], [], []>} : vector<32x16xf32>, vector<16x16xf32>, vector<32x16xf32> -> vector<32x16xf32>
    %c11_178 = arith.constant 11 : index
    %c0_179 = arith.constant 0 : index
    %c0_180 = arith.constant 0 : index
    %223 = vector.load %arg0[%c11_178, %c0_179, %c0_180] : memref<15x32x16xf32, #tpu.memory_space<vmem>>, vector<1x32x16xf32>
    %224 = vector.shape_cast %223 : vector<1x32x16xf32> to vector<32x16xf32>
    %225 = arith.addf %222, %224 : vector<32x16xf32>
    %cst_181 = arith.constant 0.000000e+00 : f32
    %226 = vector.broadcast %cst_181 : f32 to vector<32x16xf32>
    %227 = arith.maximumf %225, %226 : vector<32x16xf32>
    %cst_182 = arith.constant dense<0.000000e+00> : vector<32x16xf32>
    %228 = tpu.matmul %2, %227, %cst_182 {dimension_numbers = #tpu.dot_dimension_numbers<[1], [0], [0], [1], [0, 0, 1, 1], [], []>} : vector<32x32xf32>, vector<32x16xf32>, vector<32x16xf32> -> vector<32x16xf32>
    %cst_183 = arith.constant dense<0.000000e+00> : vector<32x16xf32>
    %229 = tpu.matmul %228, %0, %cst_183 {dimension_numbers = #tpu.dot_dimension_numbers<[1], [0], [0], [1], [0, 0, 1, 1], [], []>} : vector<32x16xf32>, vector<16x16xf32>, vector<32x16xf32> -> vector<32x16xf32>
    %c12_184 = arith.constant 12 : index
    %c0_185 = arith.constant 0 : index
    %c0_186 = arith.constant 0 : index
    %230 = vector.load %arg0[%c12_184, %c0_185, %c0_186] : memref<15x32x16xf32, #tpu.memory_space<vmem>>, vector<1x32x16xf32>
    %231 = vector.shape_cast %230 : vector<1x32x16xf32> to vector<32x16xf32>
    %232 = arith.addf %229, %231 : vector<32x16xf32>
    %cst_187 = arith.constant 0.000000e+00 : f32
    %233 = vector.broadcast %cst_187 : f32 to vector<32x16xf32>
    %234 = arith.maximumf %232, %233 : vector<32x16xf32>
    %cst_188 = arith.constant dense<0.000000e+00> : vector<32x16xf32>
    %235 = tpu.matmul %3, %234, %cst_188 {dimension_numbers = #tpu.dot_dimension_numbers<[1], [0], [0], [1], [0, 0, 1, 1], [], []>} : vector<32x32xf32>, vector<32x16xf32>, vector<32x16xf32> -> vector<32x16xf32>
    %cst_189 = arith.constant dense<0.000000e+00> : vector<32x16xf32>
    %236 = tpu.matmul %235, %0, %cst_189 {dimension_numbers = #tpu.dot_dimension_numbers<[1], [0], [0], [1], [0, 0, 1, 1], [], []>} : vector<32x16xf32>, vector<16x16xf32>, vector<32x16xf32> -> vector<32x16xf32>
    %c13_190 = arith.constant 13 : index
    %c0_191 = arith.constant 0 : index
    %c0_192 = arith.constant 0 : index
    %237 = vector.load %arg0[%c13_190, %c0_191, %c0_192] : memref<15x32x16xf32, #tpu.memory_space<vmem>>, vector<1x32x16xf32>
    %238 = vector.shape_cast %237 : vector<1x32x16xf32> to vector<32x16xf32>
    %239 = arith.addf %236, %238 : vector<32x16xf32>
    %cst_193 = arith.constant 0.000000e+00 : f32
    %240 = vector.broadcast %cst_193 : f32 to vector<32x16xf32>
    %241 = arith.maximumf %239, %240 : vector<32x16xf32>
    %cst_194 = arith.constant dense<0.000000e+00> : vector<32x16xf32>
    %242 = tpu.matmul %4, %241, %cst_194 {dimension_numbers = #tpu.dot_dimension_numbers<[1], [0], [0], [1], [0, 0, 1, 1], [], []>} : vector<32x32xf32>, vector<32x16xf32>, vector<32x16xf32> -> vector<32x16xf32>
    %c14_195 = arith.constant 14 : index
    %c0_196 = arith.constant 0 : index
    %c0_197 = arith.constant 0 : index
    %243 = vector.load %arg0[%c14_195, %c0_196, %c0_197] : memref<15x32x16xf32, #tpu.memory_space<vmem>>, vector<1x32x16xf32>
    %244 = vector.shape_cast %243 : vector<1x32x16xf32> to vector<32x16xf32>
    %245 = arith.addf %242, %244 : vector<32x16xf32>
    %cst_198 = arith.constant 0.000000e+00 : f32
    %246 = vector.broadcast %cst_198 : f32 to vector<32x16xf32>
    %247 = arith.maximumf %245, %246 : vector<32x16xf32>
    %cst_199 = arith.constant dense<0.000000e+00> : vector<1x16xf32>
    %248 = tpu.matmul %5, %247, %cst_199 {dimension_numbers = #tpu.dot_dimension_numbers<[1], [0], [0], [1], [0, 0, 1, 1], [], []>} : vector<1x32xf32>, vector<32x16xf32>, vector<1x16xf32> -> vector<1x16xf32>
    %249 = arith.addf %248, %9 : vector<1x16xf32>
    %250 = tpu.iota {dimensions = array<i32: 0>} : vector<8x16xi32>
    %cst_200 = arith.constant 0.000000e+00 : f32
    %251 = vector.broadcast %cst_200 : f32 to vector<8x16xf32>
    %c0_i32 = arith.constant 0 : i32
    %252 = vector.broadcast %c0_i32 : i32 to vector<8x16xi32>
    %253 = arith.cmpi eq, %250, %252 : vector<8x16xi32>
    %254 = vector.shape_cast %7 : vector<1x16xf32> to vector<1x16xf32>
    %255 = vector.broadcast %254 : vector<1x16xf32> to vector<8x16xf32>
    %256 = arith.select %253, %255, %251 : vector<8x16xi1>, vector<8x16xf32>
    %c1_i32 = arith.constant 1 : i32
    %257 = vector.broadcast %c1_i32 : i32 to vector<8x16xi32>
    %258 = arith.cmpi eq, %250, %257 : vector<8x16xi32>
    %259 = vector.shape_cast %57 : vector<1x16xf32> to vector<1x16xf32>
    %260 = vector.broadcast %259 : vector<1x16xf32> to vector<8x16xf32>
    %261 = arith.select %258, %260, %256 : vector<8x16xi1>, vector<8x16xf32>
    %c2_i32 = arith.constant 2 : i32
    %262 = vector.broadcast %c2_i32 : i32 to vector<8x16xi32>
    %263 = arith.cmpi eq, %250, %262 : vector<8x16xi32>
    %264 = vector.shape_cast %89 : vector<1x16xf32> to vector<1x16xf32>
    %265 = vector.broadcast %264 : vector<1x16xf32> to vector<8x16xf32>
    %266 = arith.select %263, %265, %261 : vector<8x16xi1>, vector<8x16xf32>
    %c3_i32 = arith.constant 3 : i32
    %267 = vector.broadcast %c3_i32 : i32 to vector<8x16xi32>
    %268 = arith.cmpi eq, %250, %267 : vector<8x16xi32>
    %269 = vector.shape_cast %121 : vector<1x16xf32> to vector<1x16xf32>
    %270 = vector.broadcast %269 : vector<1x16xf32> to vector<8x16xf32>
    %271 = arith.select %268, %270, %266 : vector<8x16xi1>, vector<8x16xf32>
    %c4_i32 = arith.constant 4 : i32
    %272 = vector.broadcast %c4_i32 : i32 to vector<8x16xi32>
    %273 = arith.cmpi eq, %250, %272 : vector<8x16xi32>
    %274 = vector.shape_cast %153 : vector<1x16xf32> to vector<1x16xf32>
    %275 = vector.broadcast %274 : vector<1x16xf32> to vector<8x16xf32>
    %276 = arith.select %273, %275, %271 : vector<8x16xi1>, vector<8x16xf32>
    %c5_i32 = arith.constant 5 : i32
    %277 = vector.broadcast %c5_i32 : i32 to vector<8x16xi32>
    %278 = arith.cmpi eq, %250, %277 : vector<8x16xi32>
    %279 = vector.shape_cast %185 : vector<1x16xf32> to vector<1x16xf32>
    %280 = vector.broadcast %279 : vector<1x16xf32> to vector<8x16xf32>
    %281 = arith.select %278, %280, %276 : vector<8x16xi1>, vector<8x16xf32>
    %c6_i32 = arith.constant 6 : i32
    %282 = vector.broadcast %c6_i32 : i32 to vector<8x16xi32>
    %283 = arith.cmpi eq, %250, %282 : vector<8x16xi32>
    %284 = vector.shape_cast %217 : vector<1x16xf32> to vector<1x16xf32>
    %285 = vector.broadcast %284 : vector<1x16xf32> to vector<8x16xf32>
    %286 = arith.select %283, %285, %281 : vector<8x16xi1>, vector<8x16xf32>
    %c7_i32 = arith.constant 7 : i32
    %287 = vector.broadcast %c7_i32 : i32 to vector<8x16xi32>
    %288 = arith.cmpi eq, %250, %287 : vector<8x16xi32>
    %289 = vector.shape_cast %249 : vector<1x16xf32> to vector<1x16xf32>
    %290 = vector.broadcast %289 : vector<1x16xf32> to vector<8x16xf32>
    %291 = arith.select %288, %290, %286 : vector<8x16xi1>, vector<8x16xf32>
    %c0_201 = arith.constant 0 : index
    %c0_202 = arith.constant 0 : index
    %292 = vector.load %arg3[%c0_201, %c0_202] : memref<8x16xf32, #tpu.memory_space<vmem>>, vector<8x16xf32>
    tpu.vector_store %arg3[%c0_201, %c0_202], %291 {strides = array<i32>} : memref<8x16xf32, #tpu.memory_space<vmem>>, vector<8x16xf32>,
    return
  }
}

</mosaic_0001>

<bundles_post_ra>
// kernel: tpu_custom_call.1
= control target key start
LH: loop header
LB: loop body
LE: loop exit
PB: predicated region body
PF: predicated region fallthrough
CT: control target
= control target key end

     0   :  { %vm71_vm0 = vcmask 261120   ;;  %s8210_s0 = inlined_call_operand.vmem [shape: f32[15,32,16], index: 0, kind: input, shape index: {}]   ;;  %s8211_s1 = inlined_call_operand.vmem [shape: f32[16,16], index: 1, kind: input, shape index: {}]   ;;  %s8212_s2 = inlined_call_operand.vmem [shape: f32[168,32], index: 2, kind: input, shape index: {}]   ;;  %s8213_s3 = inlined_call_operand.hbm [shape: f32[8,16], index: 3, kind: output, shape index: {}]  }
   0x1   :  { %v7157_v0 = vld [vmem:[%s8210_s0] ss:$0 sm:$0xff]  ;;  %v5361_v2 = vld [vmem:[%s8210_s0 + $0x108] sm:$0xff]  ;;  %v5362_v7 = vld [vmem:[%s8210_s0 + $0x110] sm:$0xff] }
   0x2   :  { %v5360_v1 = vld [vmem:[%s8210_s0 + $0x100] sm:$0xff]  ;;  %v46_v4 = vmul.f32 %v7157_v0, %v5361_v2  ;;  %v5366_v6 = vld [vmem:[%s8210_s0 + $0x128] sm:$0xff]  ;;  %v5363_v8 = vld [vmem:[%s8210_s0 + $0x118] sm:$0xff]  ;;  %v47_v9 = vmul.f32 %v7157_v0, %v5362_v7 }
   0x3   :  { %v45_v3 = vmul.f32 %v7157_v0, %v5360_v1  ;;  %v5365_v5 = vld [vmem:[%s8210_s0 + $0x120] sm:$0xff]  ;;  %v5367_v10 = vld [vmem:[%s8210_s0 + $0x130] sm:$0xff]  ;;  %v5368_v11 = vld [vmem:[%s8210_s0 + $0x138] sm:$0xff]  ;;  %v48_v14 = vmul.f32 %v7157_v0, %v5363_v8 }
   0x4   :  { %v55_v13 = vadd.f32 %v5366_v6, %v46_v4  ;;  %v62_v15 = vld [vmem:[%s8212_s2 + $0x60] sm:$0xff]  ;;  %v56_v16 = vadd.f32 %v5367_v10, %v47_v9 }
   0x5   :  { %v54_v12 = vadd.f32 %v5365_v5, %v45_v3  ;;  %6025 = vmatprep.mubr.msk.f32.mxu0 %vm71_vm0, %v62_v15 }
   0x6   :  { %8 = vsyncpa [#allocation3], 0  ;;  %v59_v18 = vmax.f32 %v55_v13, 0.0  ;;  %v57_v19 = vadd.f32 %v5368_v11, %v48_v14  ;;  %v60_v20 = vmax.f32 %v56_v16, 0.0  ;;  %v63_v24 = vld [vmem:[%s8212_s2 + $0x68] sm:$0xff]  ;;  %v64_v25 = vld [vmem:[%s8212_s2 + $0x70] sm:$0xff] }
   0x7   :  { %v58_v17 = vmax.f32 %v54_v12, 0.0  ;;  %v65_v26 = vld [vmem:[%s8212_s2 + $0x78] sm:$0xff]  ;;  %v7206_v27 = vld [vmem:[%s8212_s2] sm:$0xff]  ;;  %v16_v29 = vld [vmem:[%s8211_s1 + $0x8] sm:$0xff]  ;;  %vm280_vm1 = vcmask 130048   ;;  %vm7131_vm2 = vmmov 0  }
   0x8   :  { %v61_v22 = vmax.f32 %v57_v19, 0.0  ;;  %6039 = vmatprep.mubr.msk.f32.mxu1 %vm71_vm0, %v7206_v27  ;;  %v15_v28 = vld [vmem:[%s8211_s1] sm:$0xff]  ;;  %v5370_v31 = vld [vmem:[%s8210_s0 + $0x148] sm:$0xff]  ;;  %v5372_v37 = vld [vmem:[%s8210_s0 + $0x158] sm:$0xff] }
   0x9   :  { %v6710_v21 = vpack.c.bf16 %v59_v18, %v58_v17  ;;  %v7216_v30 = vpack.c.bf16 %v16_v29, %v15_v28  ;;  %v5369_v32 = vld [vmem:[%s8210_s0 + $0x140] sm:$0xff]  ;;  %v5371_v39 = vld [vmem:[%s8210_s0 + $0x150] sm:$0xff]  ;;  %v7236_v49 = vld [vmem:[%s8212_s2 + $0x8] sm:$0xff] }
   0xa   :  { %v6714_v23 = vpack.c.bf16 %v61_v22, %v60_v20  ;;  %v7241_v50 = vld [vmem:[%s8212_s2 + $0x10] sm:$0xff]  ;;  %v7250_v51 = vld [vmem:[%s8212_s2 + $0x18] sm:$0xff]  ;;  %v5377_v52 = vld [vmem:[%s8210_s0 + $0x20] sm:$0xff] }
   0xb   :  { %6711 = vmatprep.subr.bf16.mxu0 %v6710_v21  ;;  %v5378_v53 = vld [vmem:[%s8210_s0 + $0x28] sm:$0xff]  ;;  %v5379_v58 = vld [vmem:[%s8210_s0 + $0x30] sm:$0xff]  ;;  %v5380_v59 = vld [vmem:[%s8210_s0 + $0x38] sm:$0xff] }
   0xc   :  { %6713 = vmatpush3.bf16.msra.mxu0 %v6710_v21  ;;  %v7275_v1 = vld [vmem:[%s8212_s2 + $0x20] sm:$0xff]  ;;  %v7282_v2 = vld [vmem:[%s8210_s0 + $0x168] sm:$0xff]  ;;  %v7294_v8 = vld [vmem:[%s8210_s0 + $0x178] sm:$0xff] }
   0xd   :  { %6715 = vmatprep.subr.bf16.mxu0 %v6714_v23  ;;  %v7287_v3 = vld [vmem:[%s8210_s0 + $0x160] sm:$0xff]  ;;  %v7299_v10 = vld [vmem:[%s8210_s0 + $0x170] sm:$0xff]  ;;  %v7306_v20 = vld [vmem:[%s8212_s2 + $0x28] sm:$0xff] }
   0xe   :  { %v7311_v21 = vld [vmem:[%s8212_s2 + $0x30] sm:$0xff]  ;;  %v7320_v22 = vld [vmem:[%s8212_s2 + $0x38] sm:$0xff]  ;;  %v7332_v28 = vld [vmem:[%s8212_s2 + $0x40] sm:$0xff] }
   0xf   :  { %v7339_v29 = vld [vmem:[%s8210_s0 + $0x188] sm:$0xff] }
  0x10   :  { %6717 = vmatpush3.bf16.msra.mxu0 %v6714_v23 }
  0x11   :  { %6727 = vmatprep.subr.bf16.mxu0 %v7216_v30 }
  0x13   :  { %6026 = vmatmul.mubr.msk.f32.vlgmr.msra.gmra.mrb[0].mxu0 %vm71_vm0, %v63_v24 }
  0x14   :  { %6028 = vmatprep.mubr.msk.f32.mxu0 %vm71_vm0, %v64_v25  ;;  %6729 = vmatpush3.bf16.msra.mxu0 %v7216_v30 }
  0x15   :  { %6739 = vmatprep.subr.bf16.mxu0 %v7216_v30 }
  0x17   :  { %6029 = vmatmul.mubr.msk.f32.gmra.mrb[2].mxu0 %vm71_vm0, %v65_v26 }
  0xe6   :  { %v6027_v33 = vpop.f32.mrb[0].mxu0 }
  0xe7   :  { %v156_v34 = vadd.f32 %v6027_v33, %v5370_v31  ;;  %v150_v35 = vpop.f32.mrb[1].mxu0  ;;  %v7344_v31 = vld [vmem:[%s8210_s0 + $0x180] sm:$0xff] }
  0xe8   :  { %v151_v36 = vadd.f32 %v5369_v32, %v150_v35 }
  0xe9   :  { %v170_v38 = vmax.f32 %v156_v34, 0.0 }
  0xea   :  { %v169_v40 = vmax.f32 %v151_v36, 0.0  ;;  %v6030_v41 = vpop.f32.mrb[2].mxu0  ;;  %v7351_v36 = vld [vmem:[%s8210_s0 + $0x198] sm:$0xff] }
  0xeb   :  { %v166_v42 = vadd.f32 %v6030_v41, %v5372_v37  ;;  %v160_v43 = vpop.f32.mrb[3].mxu0 }
  0xec   :  { %v161_v44 = vadd.f32 %v5371_v39, %v160_v43  ;;  %v6718_v45 = vpack.c.bf16 %v170_v38, %v169_v40  ;;  %v7356_v38 = vld [vmem:[%s8210_s0 + $0x190] sm:$0xff] }
  0xed   :  { %v172_v46 = vmax.f32 %v166_v42, 0.0 }
  0xee   :  { %v171_v47 = vmax.f32 %v161_v44, 0.0  ;;  %6719 = vmatprep.subr.bf16.mxu1 %v6718_v45 }
  0xef   :  { %6721 = vmatpush3.bf16.msra.mxu1 %v6718_v45 }
  0xf0   :  { %v6722_v48 = vpack.c.bf16 %v172_v46, %v171_v47 }
  0xf2   :  { %6723 = vmatprep.subr.bf16.mxu1 %v6722_v48 }
  0xf3   :  { %6725 = vmatpush3.bf16.msra.mxu1 %v6722_v48  ;;  %v7363_v48 = vld [vmem:[%s8212_s2 + $0x48] sm:$0xff] }
  0xf6   :  { %6040 = vmatmul.mubr.msk.f32.vlgmr.msra.gmra.mrb[0].mxu1 %vm71_vm0, %v7236_v49 }
  0xf7   :  { %6042 = vmatprep.mubr.msk.f32.mxu1 %vm71_vm0, %v7241_v50 }
  0xfa   :  { %6043 = vmatmul.mubr.msk.f32.gmra.mrb[2].mxu1 %vm71_vm0, %v7250_v51 }
  0xfb   :  { %6063 = vmatprep.mubr.msk.f32.mxu1 %vm71_vm0, %v7275_v1 }
 0x1c9   :  { %v6041_v54 = vpop.f32.mrb[0].mxu1 }
 0x1ca   :  { %v256_v55 = vpop.f32.mrb[1].mxu1  ;;  %v262_v57 = vadd.f32 %v6041_v54, %v5378_v53  ;;  %v7377_v53 = vld [vmem:[%s8212_s2 + $0x58] sm:$0xff] }
 0x1cb   :  { %v257_v56 = vadd.f32 %v5377_v52, %v256_v55  ;;  %v7368_v52 = vld [vmem:[%s8212_s2 + $0x50] sm:$0xff] }
 0x1cd   :  { %v6044_v60 = vpop.f32.mrb[2].mxu1  ;;  %6049 = vmatprep.mubr.msk.f32.mxu0 %vm280_vm1, %v257_v56 }
 0x1ce   :  { %v266_v61 = vpop.f32.mrb[3].mxu1  ;;  %6050 = vmatmul.mubr.msk.f32.vlgmr.msra.gmra.mrb[4].mxu0 %vm280_vm1, %v262_v57  ;;  %v272_v63 = vadd.f32 %v6044_v60, %v5380_v59  ;;  %v7395_v59 = vld [vmem:[%s8210_s0 + $0x1a8] sm:$0xff]  ;;  %v7400_v60 = vld [vmem:[%s8210_s0 + $0x1a0] sm:$0xff] }
 0x1cf   :  { %v267_v62 = vadd.f32 %v5379_v58, %v266_v61  ;;  %6741 = vmatpush3.bf16.msra.mxu0 %v7216_v30  ;;  %v7388_v58 = vld [vmem:[%s8212_s2 + $0x80] sm:$0xff] }
 0x1d0   :  { %6751 = vmatprep.subr.bf16.mxu0 %v7216_v30 }
 0x1d1   :  { %6052 = vmatprep.mubr.msk.f32.mxu0 %vm280_vm1, %v267_v62 }
 0x1d2   :  { %6053 = vmatmul.mubr.msk.f32.gmra.mrb[6].mxu0 %vm280_vm1, %v272_v63 }
 0x2a1   :  { %v6051_v4 = vpop.f32.mrb[4].mxu0 }
 0x2a2   :  { %v365_v5 = vadd.f32 %v6051_v4, %v7282_v2  ;;  %v359_v6 = vpop.f32.mrb[5].mxu0 }
 0x2a3   :  { %v360_v7 = vadd.f32 %v7287_v3, %v359_v6 }
 0x2a4   :  { %v379_v9 = vmax.f32 %v365_v5, 0.0  ;;  %v7407_v5 = vld [vmem:[%s8210_s0 + $0x1b8] sm:$0xff] }
 0x2a5   :  { %v378_v11 = vmax.f32 %v360_v7, 0.0  ;;  %v6054_v12 = vpop.f32.mrb[6].mxu0  ;;  %v7412_v7 = vld [vmem:[%s8210_s0 + $0x1b0] sm:$0xff] }
 0x2a6   :  { %v375_v13 = vadd.f32 %v6054_v12, %v7294_v8  ;;  %v369_v14 = vpop.f32.mrb[7].mxu0 }
 0x2a7   :  { %v6730_v15 = vpack.c.bf16 %v379_v9, %v378_v11  ;;  %v370_v16 = vadd.f32 %v7299_v10, %v369_v14 }
 0x2a8   :  { %v381_v17 = vmax.f32 %v375_v13, 0.0 }
 0x2a9   :  { %v380_v18 = vmax.f32 %v370_v16, 0.0  ;;  %6731 = vmatprep.subr.bf16.mxu1 %v6730_v15 }
 0x2aa   :  { %6733 = vmatpush3.bf16.msra.mxu1 %v6730_v15 }
 0x2ab   :  { %v6734_v19 = vpack.c.bf16 %v381_v17, %v380_v18 }
 0x2ad   :  { %6735 = vmatprep.subr.bf16.mxu1 %v6734_v19 }
 0x2ae   :  { %6737 = vmatpush3.bf16.msra.mxu1 %v6734_v19  ;;  %v7419_v19 = vld [vmem:[%s8212_s2 + $0x88] sm:$0xff] }
 0x2b1   :  { %6064 = vmatmul.mubr.msk.f32.vlgmr.msra.gmra.mrb[4].mxu1 %vm71_vm0, %v7306_v20 }
 0x2b2   :  { %6066 = vmatprep.mubr.msk.f32.mxu1 %vm71_vm0, %v7311_v21 }
 0x2b5   :  { %6067 = vmatmul.mubr.msk.f32.gmra.mrb[6].mxu1 %vm71_vm0, %v7320_v22 }
 0x2b6   :  { %6087 = vmatprep.mubr.msk.f32.mxu1 %vm71_vm0, %v7332_v28 }
 0x384   :  { %v6065_v23 = vpop.f32.mrb[4].mxu1 }
 0x385   :  { %v460_v24 = vpop.f32.mrb[5].mxu1 }
 0x386   :  { %6073 = vmatprep.mubr.msk.f32.mxu0 %vm280_vm1, %v460_v24  ;;  %v7433_v24 = vld [vmem:[%s8212_s2 + $0x98] sm:$0xff] }
 0x387   :  { %6074 = vmatmul.mubr.msk.f32.vlgmr.msra.gmra.mrb[8].mxu0 %vm280_vm1, %v6065_v23  ;;  %v7424_v23 = vld [vmem:[%s8212_s2 + $0x90] sm:$0xff] }
 0x388   :  { %v6068_v25 = vpop.f32.mrb[6].mxu1  ;;  %6753 = vmatpush3.bf16.msra.mxu0 %v7216_v30 }
 0x389   :  { %v470_v26 = vpop.f32.mrb[7].mxu1 }
 0x38a   :  { %6076 = vmatprep.mubr.msk.f32.mxu0 %vm280_vm1, %v470_v26  ;;  %v7132_v26 = vmov 0.0  }
 0x38b   :  { %6077 = vmatmul.mubr.msk.f32.gmra.mrb[10].mxu0 %vm280_vm1, %v6068_v25  ;;  %v7130_v25 = vmov 0.0|0.0  }
 0x38c   :  { %6762 = vmatprep.subr.bf16.mxu0 %v7130_v25 }
 0x45a   :  { %v6075_v32 = vpop.f32.mrb[8].mxu0 }
 0x45b   :  { %v568_v33 = vadd.f32 %v6075_v32, %v7339_v29  ;;  %v562_v34 = vpop.f32.mrb[9].mxu0  ;;  %v7453_v32 = vld [vmem:[%s8210_s0 + $0x1c8] sm:$0xff] }
 0x45c   :  { %v563_v35 = vadd.f32 %v7344_v31, %v562_v34 }
 0x45d   :  { %v582_v37 = vmax.f32 %v568_v33, 0.0  ;;  %v7458_v33 = vld [vmem:[%s8210_s0 + $0x1c0] sm:$0xff] }
 0x45e   :  { %v581_v39 = vmax.f32 %v563_v35, 0.0  ;;  %v6078_v40 = vpop.f32.mrb[10].mxu0 }
 0x45f   :  { %v578_v41 = vadd.f32 %v6078_v40, %v7351_v36  ;;  %v572_v42 = vpop.f32.mrb[11].mxu0  ;;  %v7465_v40 = vld [vmem:[%s8210_s0 + $0x1d8] sm:$0xff] }
 0x460   :  { %v6742_v43 = vpack.c.bf16 %v582_v37, %v581_v39  ;;  %v573_v44 = vadd.f32 %v7356_v38, %v572_v42  ;;  %v7470_v42 = vld [vmem:[%s8210_s0 + $0x1d0] sm:$0xff] }
 0x461   :  { %v584_v45 = vmax.f32 %v578_v41, 0.0 }
 0x462   :  { %v583_v46 = vmax.f32 %v573_v44, 0.0  ;;  %6743 = vmatprep.subr.bf16.mxu1 %v6742_v43 }
 0x463   :  { %6745 = vmatpush3.bf16.msra.mxu1 %v6742_v43 }
 0x464   :  { %v6746_v47 = vpack.c.bf16 %v584_v45, %v583_v46 }
 0x466   :  { %6747 = vmatprep.subr.bf16.mxu1 %v6746_v47 }
 0x467   :  { %6749 = vmatpush3.bf16.msra.mxu1 %v6746_v47 }
 0x46a   :  { %6088 = vmatmul.mubr.msk.f32.vlgmr.msra.gmra.mrb[8].mxu1 %vm71_vm0, %v7363_v48 }
 0x46b   :  { %6090 = vmatprep.mubr.msk.f32.mxu1 %vm71_vm0, %v7368_v52 }
 0x46e   :  { %6091 = vmatmul.mubr.msk.f32.gmra.mrb[10].mxu1 %vm71_vm0, %v7377_v53 }
 0x46f   :  { %6111 = vmatprep.mubr.msk.f32.mxu1 %vm71_vm0, %v7388_v58 }
 0x53d   :  { %v6089_v54 = vpop.f32.mrb[8].mxu1 }
 0x53e   :  { %v663_v55 = vpop.f32.mrb[9].mxu1 }
 0x53f   :  { %6097 = vmatprep.mubr.msk.f32.mxu0 %vm280_vm1, %v663_v55 }
 0x540   :  { %6098 = vmatmul.mubr.msk.f32.vlgmr.msra.gmra.mrb[12].mxu0 %vm280_vm1, %v6089_v54 }
 0x541   :  { %v6092_v56 = vpop.f32.mrb[10].mxu1 }
 0x542   :  { %v673_v57 = vpop.f32.mrb[11].mxu1 }
 0x543   :  { %6100 = vmatprep.mubr.msk.f32.mxu0 %vm280_vm1, %v673_v57 }
 0x544   :  { %6101 = vmatmul.mubr.msk.f32.gmra.mrb[14].mxu0 %vm280_vm1, %v6092_v56 }
 0x545   :  { %6125 = vmatprep.mubr.msk.f32.mxu0 %vm7131_vm2, %v7132_v26 }
 0x613   :  { %v6099_v61 = vpop.f32.mrb[12].mxu0 }
 0x614   :  { %v771_v62 = vadd.f32 %v6099_v61, %v7395_v59  ;;  %v765_v63 = vpop.f32.mrb[13].mxu0 }
 0x615   :  { %v766_v4 = vadd.f32 %v7400_v60, %v765_v63 }
 0x616   :  { %v785_v6 = vmax.f32 %v771_v62, 0.0  ;;  %v5426_v62 = vld [vmem:[%s8210_s0 + $0x40] sm:$0xff] }
 0x617   :  { %v784_v9 = vmax.f32 %v766_v4, 0.0  ;;  %v6102_v11 = vpop.f32.mrb[14].mxu0 }
 0x618   :  { %v781_v12 = vadd.f32 %v6102_v11, %v7407_v5  ;;  %v775_v13 = vpop.f32.mrb[15].mxu0 }
 0x619   :  { %v6754_v14 = vpack.c.bf16 %v785_v6, %v784_v9  ;;  %v776_v15 = vadd.f32 %v7412_v7, %v775_v13  ;;  %v7481_v6 = vld [vmem:[%s8212_s2 + $0xa0] sm:$0x1]  ;;  %v5427_v13 = vld [vmem:[%s8210_s0 + $0x48] sm:$0xff] }
 0x61a   :  { %v787_v16 = vmax.f32 %v781_v12, 0.0  ;;  %v5428_v12 = vld [vmem:[%s8210_s0 + $0x50] sm:$0xff] }
 0x61b   :  { %v786_v17 = vmax.f32 %v776_v15, 0.0  ;;  %6755 = vmatprep.subr.bf16.mxu1 %v6754_v14 }
 0x61c   :  { %6757 = vmatpush3.bf16.msra.mxu1 %v6754_v14 }
 0x61d   :  { %v6758_v18 = vpack.c.bf16 %v787_v16, %v786_v17  ;;  %v5429_v16 = vld [vmem:[%s8210_s0 + $0x58] sm:$0xff] }
 0x61f   :  { %6759 = vmatprep.subr.bf16.mxu1 %v6758_v18 }
 0x620   :  { %6761 = vmatpush3.bf16.msra.mxu1 %v6758_v18 }
 0x621   :  { %6769 = vmatprep.subr.bf16.mxu1 %v6754_v14 }
 0x623   :  { %6112 = vmatmul.mubr.msk.f32.vlgmr.msra.gmra.mrb[12].mxu1 %vm71_vm0, %v7419_v19 }
 0x624   :  { %6771 = vmatpush3.bf16.msra.mxu1 %v6754_v14  ;;  %6114 = vmatprep.mubr.msk.f32.mxu1 %vm71_vm0, %v7424_v23 }
 0x625   :  { %6773 = vmatprep.subr.bf16.mxu1 %v6758_v18 }
 0x627   :  { %6115 = vmatmul.mubr.msk.f32.gmra.mrb[14].mxu1 %vm71_vm0, %v7433_v24 }
 0x628   :  { %6775 = vmatpush3.bf16.msra.mxu1 %v6758_v18  ;;  %6136 = vmatprep.mubr.msk.f32.mxu1 %vm71_vm0, %v7206_v27 }
 0x62b   :  { %6137 = vmatmul.mubr.msk.f32.vlgmr.msra.gmra.mrb[16].mxu1 %vm71_vm0, %v7236_v49 }
 0x62c   :  { %6139 = vmatprep.mubr.msk.f32.mxu1 %vm71_vm0, %v7241_v50 }
 0x62f   :  { %6140 = vmatmul.mubr.msk.f32.gmra.mrb[18].mxu1 %vm71_vm0, %v7250_v51 }
 0x630   :  { %6160 = vmatprep.mubr.msk.f32.mxu1 %vm71_vm0, %v7275_v1 }
 0x6f6   :  { %v6113_v34 = vpop.f32.mrb[12].mxu1 }
 0x6f7   :  { %v877_v35 = vadd.f32 %v6113_v34, %v7453_v32  ;;  %v871_v37 = vpop.f32.mrb[13].mxu1 }
 0x6f8   :  { %v872_v39 = vadd.f32 %v7458_v33, %v871_v37 }
 0x6f9   :  { %v891_v41 = vmax.f32 %v877_v35, 0.0 }
 0x6fa   :  { %v890_v43 = vmax.f32 %v872_v39, 0.0  ;;  %v6116_v44 = vpop.f32.mrb[14].mxu1 }
 0x6fb   :  { %v887_v45 = vadd.f32 %v6116_v44, %v7465_v40  ;;  %v881_v46 = vpop.f32.mrb[15].mxu1 }
 0x6fc   :  { %v6763_v47 = vpack.c.bf16 %v891_v41, %v890_v43  ;;  %v882_v54 = vadd.f32 %v7470_v42, %v881_v46 }
 0x6fd   :  { %v893_v55 = vmax.f32 %v887_v45, 0.0 }
 0x6fe   :  { %v892_v56 = vmax.f32 %v882_v54, 0.0  ;;  %6764 = vmatpush3.bf16.msra.mxu0 %v6763_v47  ;;  %v6138_v57 = vpop.f32.mrb[16].mxu1 }
 0x6ff   :  { %6765 = vmatprep.subr.bf16.mxu0 %v7130_v25  ;;  %v1038_v61 = vpop.f32.mrb[17].mxu1  ;;  %v1044_v15 = vadd.f32 %v6138_v57, %v5427_v13 }
 0x700   :  { %v6766_v63 = vpack.c.bf16 %v893_v55, %v892_v56  ;;  %v1039_v4 = vadd.f32 %v5426_v62, %v1038_v61 }
 0x702   :  { %6767 = vmatpush3.bf16.msra.mxu0 %v6766_v63  ;;  %v6141_v9 = vpop.f32.mrb[18].mxu1 }
 0x703   :  { %6777 = vmatprep.subr.bf16.mxu0 %v7216_v30  ;;  %v1048_v11 = vpop.f32.mrb[19].mxu1  ;;  %v1054_v17 = vadd.f32 %v6141_v9, %v5429_v16 }
 0x704   :  { %v1049_v14 = vadd.f32 %v5428_v12, %v1048_v11 }
 0x705   :  { %6126 = vmatmul.mubr.msk.f32.vlgmr.msra.gmra.mrb[16].mxu0 %vm71_vm0, %v7481_v6 }
 0x706   :  { %6779 = vmatpush3.bf16.msra.mxu0 %v7216_v30  ;;  %6146 = vmatprep.mubr.msk.f32.mxu0 %vm280_vm1, %v1039_v4 }
 0x707   :  { %6789 = vmatprep.subr.bf16.mxu0 %v7216_v30 }
 0x709   :  { %6147 = vmatmul.mubr.msk.f32.vlgmr.msra.gmra.mrb[18].mxu0 %vm280_vm1, %v1044_v15 }
 0x70a   :  { %6149 = vmatprep.mubr.msk.f32.mxu0 %vm280_vm1, %v1049_v14  ;;  %6791 = vmatpush3.bf16.msra.mxu0 %v7216_v30 }
 0x70b   :  { %6801 = vmatprep.subr.bf16.mxu0 %v7216_v30 }
 0x70d   :  { %6150 = vmatmul.mubr.msk.f32.gmra.mrb[20].mxu0 %vm280_vm1, %v1054_v17 }
 0x7d8   :  { %v7503_v18 = vpop.f32.mrb[16].mxu0 }
 0x7d9   :  { %v6127_v34 = vpop.f32.mrb[17].mxu0 }
 0x7dc   :  { %v6148_v35 = vpop.f32.mrb[18].mxu0 }
 0x7dd   :  { %v1141_v37 = vadd.f32 %v6148_v35, %v7282_v2  ;;  %v1135_v39 = vpop.f32.mrb[19].mxu0 }
 0x7de   :  { %v1136_v41 = vadd.f32 %v7287_v3, %v1135_v39 }
 0x7df   :  { %v1155_v43 = vmax.f32 %v1141_v37, 0.0 }
 0x7e0   :  { %v1154_v44 = vmax.f32 %v1136_v41, 0.0  ;;  %v6151_v45 = vpop.f32.mrb[20].mxu0 }
 0x7e1   :  { %v1151_v46 = vadd.f32 %v6151_v45, %v7294_v8  ;;  %v1145_v47 = vpop.f32.mrb[21].mxu0 }
 0x7e2   :  { %v6780_v54 = vpack.c.bf16 %v1155_v43, %v1154_v44  ;;  %v1146_v55 = vadd.f32 %v7299_v10, %v1145_v47 }
 0x7e3   :  { %v1157_v56 = vmax.f32 %v1151_v46, 0.0 }
 0x7e4   :  { %v1156_v57 = vmax.f32 %v1146_v55, 0.0  ;;  %6781 = vmatprep.subr.bf16.mxu1 %v6780_v54 }
 0x7e5   :  { %6783 = vmatpush3.bf16.msra.mxu1 %v6780_v54 }
 0x7e6   :  { %v6784_v61 = vpack.c.bf16 %v1157_v56, %v1156_v57 }
 0x7e8   :  { %6785 = vmatprep.subr.bf16.mxu1 %v6784_v61 }
 0x7e9   :  { %6787 = vmatpush3.bf16.msra.mxu1 %v6784_v61 }
 0x7ec   :  { %6161 = vmatmul.mubr.msk.f32.vlgmr.msra.gmra.mrb[20].mxu1 %vm71_vm0, %v7306_v20 }
 0x7ed   :  { %6163 = vmatprep.mubr.msk.f32.mxu1 %vm71_vm0, %v7311_v21 }
 0x7f0   :  { %6164 = vmatmul.mubr.msk.f32.gmra.mrb[22].mxu1 %vm71_vm0, %v7320_v22 }
 0x7f1   :  { %6184 = vmatprep.mubr.msk.f32.mxu1 %vm71_vm0, %v7332_v28 }
 0x8bf   :  { %v6162_v62 = vpop.f32.mrb[20].mxu1 }
 0x8c0   :  { %v1224_v63 = vpop.f32.mrb[21].mxu1 }
 0x8c1   :  { %6170 = vmatprep.mubr.msk.f32.mxu0 %vm280_vm1, %v1224_v63 }
 0x8c2   :  { %6171 = vmatmul.mubr.msk.f32.vlgmr.msra.gmra.mrb[22].mxu0 %vm280_vm1, %v6162_v62 }
 0x8c3   :  { %v6165_v4 = vpop.f32.mrb[22].mxu1  ;;  %6803 = vmatpush3.bf16.msra.mxu0 %v7216_v30 }
 0x8c4   :  { %v1234_v9 = vpop.f32.mrb[23].mxu1  ;;  %6812 = vmatprep.subr.bf16.mxu0 %v7130_v25 }
 0x8c5   :  { %6173 = vmatprep.mubr.msk.f32.mxu0 %vm280_vm1, %v1234_v9 }
 0x8c6   :  { %6174 = vmatmul.mubr.msk.f32.gmra.mrb[24].mxu0 %vm280_vm1, %v6165_v4 }
 0x995   :  { %v6172_v11 = vpop.f32.mrb[22].mxu0 }
 0x996   :  { %v1327_v12 = vadd.f32 %v6172_v11, %v7339_v29  ;;  %v1321_v13 = vpop.f32.mrb[23].mxu0 }
 0x997   :  { %v1322_v14 = vadd.f32 %v7344_v31, %v1321_v13 }
 0x998   :  { %v1341_v15 = vmax.f32 %v1327_v12, 0.0 }
 0x999   :  { %v1340_v16 = vmax.f32 %v1322_v14, 0.0  ;;  %v6175_v17 = vpop.f32.mrb[24].mxu0 }
 0x99a   :  { %v1337_v34 = vadd.f32 %v6175_v17, %v7351_v36  ;;  %v1331_v35 = vpop.f32.mrb[25].mxu0 }
 0x99b   :  { %v6792_v37 = vpack.c.bf16 %v1341_v15, %v1340_v16  ;;  %v1332_v39 = vadd.f32 %v7356_v38, %v1331_v35 }
 0x99c   :  { %v1343_v41 = vmax.f32 %v1337_v34, 0.0 }
 0x99d   :  { %v1342_v43 = vmax.f32 %v1332_v39, 0.0  ;;  %6793 = vmatprep.subr.bf16.mxu1 %v6792_v37 }
 0x99e   :  { %6795 = vmatpush3.bf16.msra.mxu1 %v6792_v37 }
 0x99f   :  { %v6796_v44 = vpack.c.bf16 %v1343_v41, %v1342_v43 }
 0x9a1   :  { %6797 = vmatprep.subr.bf16.mxu1 %v6796_v44 }
 0x9a2   :  { %6799 = vmatpush3.bf16.msra.mxu1 %v6796_v44 }
 0x9a5   :  { %6185 = vmatmul.mubr.msk.f32.vlgmr.msra.gmra.mrb[24].mxu1 %vm71_vm0, %v7363_v48 }
 0x9a6   :  { %6187 = vmatprep.mubr.msk.f32.mxu1 %vm71_vm0, %v7368_v52 }
 0x9a9   :  { %6188 = vmatmul.mubr.msk.f32.gmra.mrb[26].mxu1 %vm71_vm0, %v7377_v53 }
 0x9aa   :  { %6208 = vmatprep.mubr.msk.f32.mxu1 %vm71_vm0, %v7388_v58 }
 0xa78   :  { %v6186_v45 = vpop.f32.mrb[24].mxu1 }
 0xa79   :  { %v1410_v46 = vpop.f32.mrb[25].mxu1 }
 0xa7a   :  { %6194 = vmatprep.mubr.msk.f32.mxu0 %vm280_vm1, %v1410_v46 }
 0xa7b   :  { %6195 = vmatmul.mubr.msk.f32.vlgmr.msra.gmra.mrb[26].mxu0 %vm280_vm1, %v6186_v45 }
 0xa7c   :  { %v6189_v47 = vpop.f32.mrb[26].mxu1 }
 0xa7d   :  { %v1420_v54 = vpop.f32.mrb[27].mxu1 }
 0xa7e   :  { %6197 = vmatprep.mubr.msk.f32.mxu0 %vm280_vm1, %v1420_v54 }
 0xa7f   :  { %6198 = vmatmul.mubr.msk.f32.gmra.mrb[28].mxu0 %vm280_vm1, %v6189_v47 }
 0xa80   :  { %6222 = vmatprep.mubr.msk.f32.mxu0 %vm7131_vm2, %v7132_v26 }
 0xb4e   :  { %v6196_v55 = vpop.f32.mrb[26].mxu0 }
 0xb4f   :  { %v1513_v56 = vadd.f32 %v6196_v55, %v7395_v59  ;;  %v1507_v57 = vpop.f32.mrb[27].mxu0 }
 0xb50   :  { %v1508_v61 = vadd.f32 %v7400_v60, %v1507_v57 }
 0xb51   :  { %v1527_v62 = vmax.f32 %v1513_v56, 0.0 }
 0xb52   :  { %v1526_v63 = vmax.f32 %v1508_v61, 0.0  ;;  %v6199_v4 = vpop.f32.mrb[28].mxu0  ;;  %v5459_v61 = vld [vmem:[%s8210_s0 + $0x60] sm:$0xff] }
 0xb53   :  { %v1523_v9 = vadd.f32 %v6199_v4, %v7407_v5  ;;  %v1517_v11 = vpop.f32.mrb[29].mxu0 }
 0xb54   :  { %v6804_v12 = vpack.c.bf16 %v1527_v62, %v1526_v63  ;;  %v1518_v13 = vadd.f32 %v7412_v7, %v1517_v11  ;;  %v5461_v11 = vld [vmem:[%s8210_s0 + $0x70] sm:$0xff] }
 0xb55   :  { %v1529_v14 = vmax.f32 %v1523_v9, 0.0 }
 0xb56   :  { %v1528_v15 = vmax.f32 %v1518_v13, 0.0  ;;  %6805 = vmatprep.subr.bf16.mxu1 %v6804_v12 }
 0xb57   :  { %6807 = vmatpush3.bf16.msra.mxu1 %v6804_v12 }
 0xb58   :  { %v6808_v16 = vpack.c.bf16 %v1529_v14, %v1528_v15  ;;  %v5462_v15 = vld [vmem:[%s8210_s0 + $0x78] sm:$0xff] }
 0xb5a   :  { %6809 = vmatprep.subr.bf16.mxu1 %v6808_v16 }
 0xb5b   :  { %6811 = vmatpush3.bf16.msra.mxu1 %v6808_v16 }
 0xb5c   :  { %6819 = vmatprep.subr.bf16.mxu1 %v6804_v12 }
 0xb5e   :  { %6209 = vmatmul.mubr.msk.f32.vlgmr.msra.gmra.mrb[28].mxu1 %vm71_vm0, %v7419_v19 }
 0xb5f   :  { %6821 = vmatpush3.bf16.msra.mxu1 %v6804_v12  ;;  %6211 = vmatprep.mubr.msk.f32.mxu1 %vm71_vm0, %v7424_v23  ;;  %v5460_v12 = vld [vmem:[%s8210_s0 + $0x68] sm:$0xff] }
 0xb60   :  { %6823 = vmatprep.subr.bf16.mxu1 %v6808_v16 }
 0xb62   :  { %6212 = vmatmul.mubr.msk.f32.gmra.mrb[30].mxu1 %vm71_vm0, %v7433_v24 }
 0xb63   :  { %6825 = vmatpush3.bf16.msra.mxu1 %v6808_v16  ;;  %6233 = vmatprep.mubr.msk.f32.mxu1 %vm71_vm0, %v7206_v27 }
 0xb64   :  { %6839 = vmatprep.subr.bf16.mxu1 %v7216_v30 }
 0xb66   :  { %6234 = vmatmul.mubr.msk.f32.vlgmr.msra.gmra.mrb[32].mxu1 %vm71_vm0, %v7236_v49 }
 0xb67   :  { %6236 = vmatprep.mubr.msk.f32.mxu1 %vm71_vm0, %v7241_v50  ;;  %6841 = vmatpush3.bf16.msra.mxu1 %v7216_v30 }
 0xb68   :  { %6851 = vmatprep.subr.bf16.mxu1 %v7216_v30 }
 0xb6a   :  { %6237 = vmatmul.mubr.msk.f32.gmra.mrb[34].mxu1 %vm71_vm0, %v7250_v51 }
 0xc31   :  { %v6210_v17 = vpop.f32.mrb[28].mxu1 }
 0xc32   :  { %v1602_v34 = vadd.f32 %v6210_v17, %v7453_v32  ;;  %v1596_v35 = vpop.f32.mrb[29].mxu1  ;;  %v5299_v17 = vlaneseq }
 0xc33   :  { %v1597_v37 = vadd.f32 %v7458_v33, %v1596_v35  ;;  %v7594_v35 = vld [vmem:[%s8210_s0 + $0x1] sm:$0x1] }
 0xc34   :  { %v1616_v39 = vmax.f32 %v1602_v34, 0.0  ;;  %v7589_v34 = vshrl.u32 %v5299_v17, 7 }
 0xc35   :  { %v1615_v41 = vmax.f32 %v1597_v37, 0.0  ;;  %v6213_v43 = vpop.f32.mrb[30].mxu1  ;;  %v964_v37 = vadd.f32 %v7503_v18, %v7594_v35 }
 0xc36   :  { %v1612_v44 = vadd.f32 %v6213_v43, %v7465_v40  ;;  %v1606_v45 = vpop.f32.mrb[31].mxu1  ;;  %vm5301_vm3 = vcmp.eq.s32.totalorder %v7589_v34, 0  ;;  %vm5303_vm4 = vcmp.eq.s32.totalorder %v7589_v34, 1  ;;  %vm5309_vm5 = vcmp.eq.s32.totalorder %v7589_v34, 2 }
 0xc37   :  { %v6813_v46 = vpack.c.bf16 %v1616_v39, %v1615_v41  ;;  %v1607_v47 = vadd.f32 %v7470_v42, %v1606_v45  ;;  %v7599_v39 = vsub.s32 0, %v7589_v34  ;;  %vm5315_vm6 = vcmp.eq.s32.totalorder %v7589_v34, 3 }
 0xc38   :  { %v1618_v54 = vmax.f32 %v1612_v44, 0.0  ;;  %v5302_v44 = vsel %vm5301_vm3, %v7157_v0, 0.0  ;;  %vm5321_vm7 = vcmp.eq.s32.totalorder %v7589_v34, 4  ;;  %vm5327_vm8 = vcmp.eq.s32.totalorder %v7589_v34, 5 }
 0xc39   :  { %v1617_v55 = vmax.f32 %v1607_v47, 0.0  ;;  %6814 = vmatpush3.bf16.msra.mxu0 %v6813_v46  ;;  %v6235_v56 = vpop.f32.mrb[32].mxu1  ;;  %v5307_v41 = vrot.slane %v964_v37, %v7599_v39  ;;  %vm5333_vm9 = vcmp.eq.s32.totalorder %v7589_v34, 6  ;;  %vm5339_vm10 = vcmp.eq.s32.totalorder %v7589_v34, 7 }
 0xc3a   :  { %6815 = vmatprep.subr.bf16.mxu0 %v7130_v25  ;;  %v1760_v57 = vpop.f32.mrb[33].mxu1  ;;  %v1766_v14 = vadd.f32 %v6235_v56, %v5460_v12 }
 0xc3b   :  { %v6816_v62 = vpack.c.bf16 %v1618_v54, %v1617_v55  ;;  %v1761_v63 = vadd.f32 %v5459_v61, %v1760_v57  ;;  %v5308_v18 = vsel %vm5303_vm4, %v5307_v41, %v5302_v44 }
 0xc3d   :  { %6817 = vmatpush3.bf16.msra.mxu0 %v6816_v62  ;;  %v6238_v4 = vpop.f32.mrb[34].mxu1 }
 0xc3e   :  { %6827 = vmatprep.subr.bf16.mxu0 %v7216_v30  ;;  %v1770_v9 = vpop.f32.mrb[35].mxu1  ;;  %v1776_v16 = vadd.f32 %v6238_v4, %v5462_v15 }
 0xc3f   :  { %v1771_v13 = vadd.f32 %v5461_v11, %v1770_v9 }
 0xc40   :  { %6223 = vmatmul.mubr.msk.f32.vlgmr.msra.gmra.mrb[30].mxu0 %vm71_vm0, %v7481_v6 }
 0xc41   :  { %6829 = vmatpush3.bf16.msra.mxu0 %v7216_v30  ;;  %6243 = vmatprep.mubr.msk.f32.mxu0 %vm280_vm1, %v1761_v63 }
 0xc44   :  { %6244 = vmatmul.mubr.msk.f32.vlgmr.msra.gmra.mrb[32].mxu0 %vm280_vm1, %v1766_v14 }
 0xc45   :  { %6246 = vmatprep.mubr.msk.f32.mxu0 %vm280_vm1, %v1771_v13 }
 0xc48   :  { %6247 = vmatmul.mubr.msk.f32.gmra.mrb[34].mxu0 %vm280_vm1, %v1776_v16 }
 0xc49   :  { %6257 = vmatprep.mubr.msk.f32.mxu0 %vm71_vm0, %v7275_v1 }
 0xd13   :  { %v1685_v43 = vpop.f32.mrb[30].mxu0 }
 0xd14   :  { %v1686_v45 = vadd.f32 %v1685_v43, %v7594_v35  ;;  %v6224_v46 = vpop.f32.mrb[31].mxu0 }
 0xd16   :  { %v5313_v47 = vrot.slane %v1686_v45, %v7599_v39 }
 0xd17   :  { %v6245_v54 = vpop.f32.mrb[32].mxu0 }
 0xd18   :  { %v7608_v55 = vsel %vm5309_vm5, %v5313_v47, %v5308_v18  ;;  %v1863_v56 = vadd.f32 %v6245_v54, %v7282_v2  ;;  %v1857_v57 = vpop.f32.mrb[33].mxu0 }
 0xd19   :  { %v1858_v61 = vadd.f32 %v7287_v3, %v1857_v57 }
 0xd1a   :  { %v1877_v62 = vmax.f32 %v1863_v56, 0.0 }
 0xd1b   :  { %v1876_v0 = vmax.f32 %v1858_v61, 0.0  ;;  %v6248_v63 = vpop.f32.mrb[34].mxu0 }
 0xd1c   :  { %v1873_v4 = vadd.f32 %v6248_v63, %v7294_v8  ;;  %v1867_v9 = vpop.f32.mrb[35].mxu0 }
 0xd1d   :  { %v6830_v11 = vpack.c.bf16 %v1877_v62, %v1876_v0  ;;  %v1868_v12 = vadd.f32 %v7299_v10, %v1867_v9 }
 0xd1e   :  { %v1879_v13 = vmax.f32 %v1873_v4, 0.0 }
 0xd1f   :  { %v1878_v14 = vmax.f32 %v1868_v12, 0.0  ;;  %6831 = vmatprep.subr.bf16.mxu0 %v6830_v11 }
 0xd20   :  { %6833 = vmatpush3.bf16.msra.mxu0 %v6830_v11 }
 0xd21   :  { %v6834_v15 = vpack.c.bf16 %v1879_v13, %v1878_v14 }
 0xd23   :  { %6835 = vmatprep.subr.bf16.mxu0 %v6834_v15 }
 0xd24   :  { %6837 = vmatpush3.bf16.msra.mxu0 %v6834_v15 }
 0xd27   :  { %6258 = vmatmul.mubr.msk.f32.vlgmr.msra.gmra.mrb[36].mxu0 %vm71_vm0, %v7306_v20 }
 0xd28   :  { %6260 = vmatprep.mubr.msk.f32.mxu0 %vm71_vm0, %v7311_v21 }
 0xd2b   :  { %6261 = vmatmul.mubr.msk.f32.gmra.mrb[38].mxu0 %vm71_vm0, %v7320_v22 }
 0xd2c   :  { %6281 = vmatprep.mubr.msk.f32.mxu0 %vm71_vm0, %v7332_v28 }
 0xdfa   :  { %v6259_v16 = vpop.f32.mrb[36].mxu0 }
 0xdfb   :  { %v1946_v17 = vpop.f32.mrb[37].mxu0 }
 0xdfc   :  { %6267 = vmatprep.mubr.msk.f32.mxu1 %vm280_vm1, %v1946_v17 }
 0xdfd   :  { %6268 = vmatmul.mubr.msk.f32.vlgmr.msra.gmra.mrb[36].mxu1 %vm280_vm1, %v6259_v16 }
 0xdfe   :  { %v6262_v37 = vpop.f32.mrb[38].mxu0  ;;  %6853 = vmatpush3.bf16.msra.mxu1 %v7216_v30 }
 0xdff   :  { %v1956_v41 = vpop.f32.mrb[39].mxu0  ;;  %6862 = vmatprep.subr.bf16.mxu1 %v7130_v25 }
 0xe00   :  { %6270 = vmatprep.mubr.msk.f32.mxu1 %vm280_vm1, %v1956_v41 }
 0xe01   :  { %6271 = vmatmul.mubr.msk.f32.gmra.mrb[38].mxu1 %vm280_vm1, %v6262_v37 }
 0xed0   :  { %v6269_v43 = vpop.f32.mrb[36].mxu1 }
 0xed1   :  { %v2049_v44 = vadd.f32 %v6269_v43, %v7339_v29  ;;  %v2043_v45 = vpop.f32.mrb[37].mxu1 }
 0xed2   :  { %v2044_v46 = vadd.f32 %v7344_v31, %v2043_v45 }
 0xed3   :  { %v2063_v47 = vmax.f32 %v2049_v44, 0.0 }
 0xed4   :  { %v2062_v18 = vmax.f32 %v2044_v46, 0.0  ;;  %v6272_v54 = vpop.f32.mrb[38].mxu1 }
 0xed5   :  { %v2059_v56 = vadd.f32 %v6272_v54, %v7351_v36  ;;  %v2053_v57 = vpop.f32.mrb[39].mxu1 }
 0xed6   :  { %v6842_v61 = vpack.c.bf16 %v2063_v47, %v2062_v18  ;;  %v2054_v62 = vadd.f32 %v7356_v38, %v2053_v57 }
 0xed7   :  { %v2065_v0 = vmax.f32 %v2059_v56, 0.0 }
 0xed8   :  { %v2064_v63 = vmax.f32 %v2054_v62, 0.0  ;;  %6843 = vmatprep.subr.bf16.mxu0 %v6842_v61 }
 0xed9   :  { %6845 = vmatpush3.bf16.msra.mxu0 %v6842_v61 }
 0xeda   :  { %v6846_v4 = vpack.c.bf16 %v2065_v0, %v2064_v63 }
 0xedc   :  { %6847 = vmatprep.subr.bf16.mxu0 %v6846_v4 }
 0xedd   :  { %6849 = vmatpush3.bf16.msra.mxu0 %v6846_v4 }
 0xee0   :  { %6282 = vmatmul.mubr.msk.f32.vlgmr.msra.gmra.mrb[40].mxu0 %vm71_vm0, %v7363_v48 }
 0xee1   :  { %6284 = vmatprep.mubr.msk.f32.mxu0 %vm71_vm0, %v7368_v52 }
 0xee4   :  { %6285 = vmatmul.mubr.msk.f32.gmra.mrb[42].mxu0 %vm71_vm0, %v7377_v53 }
 0xee5   :  { %6305 = vmatprep.mubr.msk.f32.mxu0 %vm71_vm0, %v7388_v58 }
 0xfb3   :  { %v6283_v9 = vpop.f32.mrb[40].mxu0 }
 0xfb4   :  { %v2132_v11 = vpop.f32.mrb[41].mxu0 }
 0xfb5   :  { %6291 = vmatprep.mubr.msk.f32.mxu1 %vm280_vm1, %v2132_v11 }
 0xfb6   :  { %6292 = vmatmul.mubr.msk.f32.vlgmr.msra.gmra.mrb[40].mxu1 %vm280_vm1, %v6283_v9 }
 0xfb7   :  { %v6286_v12 = vpop.f32.mrb[42].mxu0 }
 0xfb8   :  { %v2142_v13 = vpop.f32.mrb[43].mxu0 }
 0xfb9   :  { %6294 = vmatprep.mubr.msk.f32.mxu1 %vm280_vm1, %v2142_v13 }
 0xfba   :  { %6295 = vmatmul.mubr.msk.f32.gmra.mrb[42].mxu1 %vm280_vm1, %v6286_v12 }
 0xfbb   :  { %6319 = vmatprep.mubr.msk.f32.mxu1 %vm7131_vm2, %v7132_v26 }
0x1089   :  { %v6293_v14 = vpop.f32.mrb[40].mxu1 }
0x108a   :  { %v2235_v15 = vadd.f32 %v6293_v14, %v7395_v59  ;;  %v2229_v16 = vpop.f32.mrb[41].mxu1 }
0x108b   :  { %v2230_v17 = vadd.f32 %v7400_v60, %v2229_v16 }
0x108c   :  { %v2249_v37 = vmax.f32 %v2235_v15, 0.0  ;;  %v5492_v15 = vld [vmem:[%s8210_s0 + $0x80] sm:$0xff] }
0x108d   :  { %v2248_v41 = vmax.f32 %v2230_v17, 0.0  ;;  %v6296_v43 = vpop.f32.mrb[42].mxu1 }
0x108e   :  { %v2245_v44 = vadd.f32 %v6296_v43, %v7407_v5  ;;  %v2239_v45 = vpop.f32.mrb[43].mxu1  ;;  %v5494_v43 = vld [vmem:[%s8210_s0 + $0x90] sm:$0xff] }
0x108f   :  { %v6854_v46 = vpack.c.bf16 %v2249_v37, %v2248_v41  ;;  %v2240_v47 = vadd.f32 %v7412_v7, %v2239_v45 }
0x1090   :  { %v2251_v18 = vmax.f32 %v2245_v44, 0.0  ;;  %v5493_v44 = vld [vmem:[%s8210_s0 + $0x88] sm:$0xff] }
0x1091   :  { %v2250_v54 = vmax.f32 %v2240_v47, 0.0  ;;  %6855 = vmatprep.subr.bf16.mxu0 %v6854_v46  ;;  %v5495_v47 = vld [vmem:[%s8210_s0 + $0x98] sm:$0xff] }
0x1092   :  { %6857 = vmatpush3.bf16.msra.mxu0 %v6854_v46 }
0x1093   :  { %v6858_v56 = vpack.c.bf16 %v2251_v18, %v2250_v54 }
0x1095   :  { %6859 = vmatprep.subr.bf16.mxu0 %v6858_v56 }
0x1096   :  { %6861 = vmatpush3.bf16.msra.mxu0 %v6858_v56 }
0x1097   :  { %6869 = vmatprep.subr.bf16.mxu0 %v6854_v46 }
0x1099   :  { %6306 = vmatmul.mubr.msk.f32.vlgmr.msra.gmra.mrb[44].mxu0 %vm71_vm0, %v7419_v19 }
0x109a   :  { %6871 = vmatpush3.bf16.msra.mxu0 %v6854_v46  ;;  %6308 = vmatprep.mubr.msk.f32.mxu0 %vm71_vm0, %v7424_v23 }
0x109b   :  { %6873 = vmatprep.subr.bf16.mxu0 %v6858_v56 }
0x109d   :  { %6309 = vmatmul.mubr.msk.f32.gmra.mrb[46].mxu0 %vm71_vm0, %v7433_v24 }
0x109e   :  { %6875 = vmatpush3.bf16.msra.mxu0 %v6858_v56  ;;  %6330 = vmatprep.mubr.msk.f32.mxu0 %vm71_vm0, %v7206_v27 }
0x109f   :  { %6889 = vmatprep.subr.bf16.mxu0 %v7216_v30 }
0x10a1   :  { %6331 = vmatmul.mubr.msk.f32.vlgmr.msra.gmra.mrb[48].mxu0 %vm71_vm0, %v7236_v49 }
0x10a2   :  { %6333 = vmatprep.mubr.msk.f32.mxu0 %vm71_vm0, %v7241_v50  ;;  %6891 = vmatpush3.bf16.msra.mxu0 %v7216_v30 }
0x10a3   :  { %6901 = vmatprep.subr.bf16.mxu0 %v7216_v30 }
0x10a5   :  { %6334 = vmatmul.mubr.msk.f32.gmra.mrb[50].mxu0 %vm71_vm0, %v7250_v51 }
0x116c   :  { %v6307_v57 = vpop.f32.mrb[44].mxu0 }
0x116d   :  { %v2324_v61 = vadd.f32 %v6307_v57, %v7453_v32  ;;  %v2318_v62 = vpop.f32.mrb[45].mxu0 }
0x116e   :  { %v2319_v27 = vadd.f32 %v7458_v33, %v2318_v62 }
0x116f   :  { %v2338_v0 = vmax.f32 %v2324_v61, 0.0 }
0x1170   :  { %v2337_v63 = vmax.f32 %v2319_v27, 0.0  ;;  %v6310_v4 = vpop.f32.mrb[46].mxu0 }
0x1171   :  { %v2334_v49 = vadd.f32 %v6310_v4, %v7465_v40  ;;  %v2328_v9 = vpop.f32.mrb[47].mxu0 }
0x1172   :  { %v6863_v50 = vpack.c.bf16 %v2338_v0, %v2337_v63  ;;  %v2329_v11 = vadd.f32 %v7470_v42, %v2328_v9 }
0x1173   :  { %v2340_v12 = vmax.f32 %v2334_v49, 0.0 }
0x1174   :  { %v2339_v13 = vmax.f32 %v2329_v11, 0.0  ;;  %6864 = vmatpush3.bf16.msra.mxu1 %v6863_v50  ;;  %v6332_v14 = vpop.f32.mrb[48].mxu0 }
0x1175   :  { %6865 = vmatprep.subr.bf16.mxu1 %v7130_v25  ;;  %v2482_v51 = vpop.f32.mrb[49].mxu0  ;;  %v2488_v46 = vadd.f32 %v6332_v14, %v5493_v44 }
0x1176   :  { %v6866_v16 = vpack.c.bf16 %v2340_v12, %v2339_v13  ;;  %v2483_v17 = vadd.f32 %v5492_v15, %v2482_v51 }
0x1178   :  { %6867 = vmatpush3.bf16.msra.mxu1 %v6866_v16  ;;  %v6335_v37 = vpop.f32.mrb[50].mxu0 }
0x1179   :  { %6877 = vmatprep.subr.bf16.mxu1 %v7216_v30  ;;  %v2492_v41 = vpop.f32.mrb[51].mxu0  ;;  %v2498_v18 = vadd.f32 %v6335_v37, %v5495_v47 }
0x117a   :  { %v2493_v45 = vadd.f32 %v5494_v43, %v2492_v41 }
0x117b   :  { %6320 = vmatmul.mubr.msk.f32.vlgmr.msra.gmra.mrb[44].mxu1 %vm71_vm0, %v7481_v6 }
0x117c   :  { %6879 = vmatpush3.bf16.msra.mxu1 %v7216_v30  ;;  %6340 = vmatprep.mubr.msk.f32.mxu1 %vm280_vm1, %v2483_v17 }
0x117f   :  { %6341 = vmatmul.mubr.msk.f32.vlgmr.msra.gmra.mrb[46].mxu1 %vm280_vm1, %v2488_v46 }
0x1180   :  { %6343 = vmatprep.mubr.msk.f32.mxu1 %vm280_vm1, %v2493_v45 }
0x1183   :  { %6344 = vmatmul.mubr.msk.f32.gmra.mrb[48].mxu1 %vm280_vm1, %v2498_v18 }
0x1184   :  { %6354 = vmatprep.mubr.msk.f32.mxu1 %vm71_vm0, %v7275_v1 }
0x124e   :  { %v2407_v54 = vpop.f32.mrb[44].mxu1 }
0x124f   :  { %v2408_v56 = vadd.f32 %v2407_v54, %v7594_v35  ;;  %v6321_v57 = vpop.f32.mrb[45].mxu1 }
0x1251   :  { %v5319_v61 = vrot.slane %v2408_v56, %v7599_v39 }
0x1252   :  { %v6342_v62 = vpop.f32.mrb[46].mxu1 }
0x1253   :  { %v7698_v27 = vsel %vm5315_vm6, %v5319_v61, %v7608_v55  ;;  %v2585_v0 = vadd.f32 %v6342_v62, %v7282_v2  ;;  %v2579_v63 = vpop.f32.mrb[47].mxu1 }
0x1254   :  { %v2580_v4 = vadd.f32 %v7287_v3, %v2579_v63 }
0x1255   :  { %v2599_v49 = vmax.f32 %v2585_v0, 0.0 }
0x1256   :  { %v2598_v9 = vmax.f32 %v2580_v4, 0.0  ;;  %v6345_v1 = vpop.f32.mrb[48].mxu1 }
0x1257   :  { %v2595_v50 = vadd.f32 %v6345_v1, %v7294_v8  ;;  %v2589_v11 = vpop.f32.mrb[49].mxu1 }
0x1258   :  { %v6880_v12 = vpack.c.bf16 %v2599_v49, %v2598_v9  ;;  %v2590_v13 = vadd.f32 %v7299_v10, %v2589_v11 }
0x1259   :  { %v2601_v14 = vmax.f32 %v2595_v50, 0.0 }
0x125a   :  { %v2600_v51 = vmax.f32 %v2590_v13, 0.0  ;;  %6881 = vmatprep.subr.bf16.mxu1 %v6880_v12 }
0x125b   :  { %6883 = vmatpush3.bf16.msra.mxu1 %v6880_v12 }
0x125c   :  { %v6884_v55 = vpack.c.bf16 %v2601_v14, %v2600_v51 }
0x125e   :  { %6885 = vmatprep.subr.bf16.mxu1 %v6884_v55 }
0x125f   :  { %6887 = vmatpush3.bf16.msra.mxu1 %v6884_v55 }
0x1262   :  { %6355 = vmatmul.mubr.msk.f32.vlgmr.msra.gmra.mrb[50].mxu1 %vm71_vm0, %v7306_v20 }
0x1263   :  { %6357 = vmatprep.mubr.msk.f32.mxu1 %vm71_vm0, %v7311_v21 }
0x1266   :  { %6358 = vmatmul.mubr.msk.f32.gmra.mrb[52].mxu1 %vm71_vm0, %v7320_v22 }
0x1267   :  { %6378 = vmatprep.mubr.msk.f32.mxu1 %vm71_vm0, %v7332_v28 }
0x1335   :  { %v6356_v2 = vpop.f32.mrb[50].mxu1 }
0x1336   :  { %v2668_v3 = vpop.f32.mrb[51].mxu1 }
0x1337   :  { %6364 = vmatprep.mubr.msk.f32.mxu0 %vm280_vm1, %v2668_v3 }
0x1338   :  { %6365 = vmatmul.mubr.msk.f32.vlgmr.msra.gmra.mrb[52].mxu0 %vm280_vm1, %v6356_v2 }
0x1339   :  { %v6359_v8 = vpop.f32.mrb[52].mxu1  ;;  %6903 = vmatpush3.bf16.msra.mxu0 %v7216_v30 }
0x133a   :  { %v2678_v10 = vpop.f32.mrb[53].mxu1  ;;  %6912 = vmatprep.subr.bf16.mxu0 %v7130_v25 }
0x133b   :  { %6367 = vmatprep.mubr.msk.f32.mxu0 %vm280_vm1, %v2678_v10 }
0x133c   :  { %6368 = vmatmul.mubr.msk.f32.gmra.mrb[54].mxu0 %vm280_vm1, %v6359_v8 }
0x140b   :  { %v6366_v20 = vpop.f32.mrb[52].mxu0 }
0x140c   :  { %v2771_v21 = vadd.f32 %v6366_v20, %v7339_v29  ;;  %v2765_v22 = vpop.f32.mrb[53].mxu0 }
0x140d   :  { %v2766_v28 = vadd.f32 %v7344_v31, %v2765_v22 }
0x140e   :  { %v2785_v15 = vmax.f32 %v2771_v21, 0.0  ;;  %v5526_v21 = vld [vmem:[%s8210_s0 + $0xa8] sm:$0xff] }
0x140f   :  { %v2784_v16 = vmax.f32 %v2766_v28, 0.0  ;;  %v6369_v17 = vpop.f32.mrb[54].mxu0 }
0x1410   :  { %v2781_v37 = vadd.f32 %v6369_v17, %v7351_v36  ;;  %v2775_v41 = vpop.f32.mrb[55].mxu0 }
0x1411   :  { %v6892_v43 = vpack.c.bf16 %v2785_v15, %v2784_v16  ;;  %v2776_v44 = vadd.f32 %v7356_v38, %v2775_v41  ;;  %v5528_v15 = vld [vmem:[%s8210_s0 + $0xb8] sm:$0xff] }
0x1412   :  { %v2787_v45 = vmax.f32 %v2781_v37, 0.0 }
0x1413   :  { %v2786_v46 = vmax.f32 %v2776_v44, 0.0  ;;  %6893 = vmatprep.subr.bf16.mxu1 %v6892_v43 }
0x1414   :  { %6895 = vmatpush3.bf16.msra.mxu1 %v6892_v43 }
0x1415   :  { %v6896_v47 = vpack.c.bf16 %v2787_v45, %v2786_v46  ;;  %v7818_v46 = vld [vmem:[%s8210_s0 + $0x168] sm:$0xff] }
0x1417   :  { %6897 = vmatprep.subr.bf16.mxu1 %v6896_v47 }
0x1418   :  { %6899 = vmatpush3.bf16.msra.mxu1 %v6896_v47 }
0x141b   :  { %6379 = vmatmul.mubr.msk.f32.vlgmr.msra.gmra.mrb[54].mxu1 %vm71_vm0, %v7363_v48 }
0x141c   :  { %6381 = vmatprep.mubr.msk.f32.mxu1 %vm71_vm0, %v7368_v52 }
0x141f   :  { %6382 = vmatmul.mubr.msk.f32.gmra.mrb[56].mxu1 %vm71_vm0, %v7377_v53 }
0x1420   :  { %6402 = vmatprep.mubr.msk.f32.mxu1 %vm71_vm0, %v7388_v58 }
0x14ee   :  { %v6380_v29 = vpop.f32.mrb[54].mxu1 }
0x14ef   :  { %v2854_v31 = vpop.f32.mrb[55].mxu1 }
0x14f0   :  { %6388 = vmatprep.mubr.msk.f32.mxu0 %vm280_vm1, %v2854_v31  ;;  %v7824_v31 = vld [vmem:[%s8210_s0 + $0x160] sm:$0xff] }
0x14f1   :  { %6389 = vmatmul.mubr.msk.f32.vlgmr.msra.gmra.mrb[56].mxu0 %vm280_vm1, %v6380_v29 }
0x14f2   :  { %v6383_v36 = vpop.f32.mrb[56].mxu1 }
0x14f3   :  { %v2864_v38 = vpop.f32.mrb[57].mxu1 }
0x14f4   :  { %6391 = vmatprep.mubr.msk.f32.mxu0 %vm280_vm1, %v2864_v38 }
0x14f5   :  { %6392 = vmatmul.mubr.msk.f32.gmra.mrb[58].mxu0 %vm280_vm1, %v6383_v36 }
0x14f6   :  { %6416 = vmatprep.mubr.msk.f32.mxu0 %vm7131_vm2, %v7132_v26 }
0x15c4   :  { %v6390_v48 = vpop.f32.mrb[56].mxu0 }
0x15c5   :  { %v2957_v52 = vadd.f32 %v6390_v48, %v7395_v59  ;;  %v2951_v53 = vpop.f32.mrb[57].mxu0  ;;  %v7749_v59 = vld [vmem:[%s8212_s2] sm:$0xff] }
0x15c6   :  { %v2952_v58 = vadd.f32 %v7400_v60, %v2951_v53  ;;  %v7757_v60 = vld [vmem:[%s8212_s2 + $0x8] sm:$0xff] }
0x15c7   :  { %v2971_v18 = vmax.f32 %v2957_v52, 0.0 }
0x15c8   :  { %v2970_v54 = vmax.f32 %v2952_v58, 0.0  ;;  %v6393_v56 = vpop.f32.mrb[58].mxu0 }
0x15c9   :  { %v2967_v57 = vadd.f32 %v6393_v56, %v7407_v5  ;;  %v2961_v61 = vpop.f32.mrb[59].mxu0  ;;  %v7764_v5 = vld [vmem:[%s8212_s2 + $0x10] sm:$0xff] }
0x15ca   :  { %v6904_v62 = vpack.c.bf16 %v2971_v18, %v2970_v54  ;;  %v2962_v0 = vadd.f32 %v7412_v7, %v2961_v61  ;;  %v7773_v7 = vld [vmem:[%s8212_s2 + $0x18] sm:$0xff]  ;;  %v7836_v54 = vld [vmem:[%s8210_s0 + $0x170] sm:$0xff] }
0x15cb   :  { %v2973_v63 = vmax.f32 %v2967_v57, 0.0 }
0x15cc   :  { %v2972_v4 = vmax.f32 %v2962_v0, 0.0  ;;  %6905 = vmatprep.subr.bf16.mxu1 %v6904_v62  ;;  %v7842_v0 = vld [vmem:[%s8212_s2 + $0x28] sm:$0xff] }
0x15cd   :  { %6907 = vmatpush3.bf16.msra.mxu1 %v6904_v62 }
0x15ce   :  { %v6908_v49 = vpack.c.bf16 %v2973_v63, %v2972_v4  ;;  %v7849_v63 = vld [vmem:[%s8212_s2 + $0x30] sm:$0xff]  ;;  %v7856_v4 = vld [vmem:[%s8212_s2 + $0x38] sm:$0xff] }
0x15d0   :  { %6909 = vmatprep.subr.bf16.mxu1 %v6908_v49 }
0x15d1   :  { %6911 = vmatpush3.bf16.msra.mxu1 %v6908_v49 }
0x15d2   :  { %6919 = vmatprep.subr.bf16.mxu1 %v6904_v62 }
0x15d4   :  { %6403 = vmatmul.mubr.msk.f32.vlgmr.msra.gmra.mrb[58].mxu1 %vm71_vm0, %v7419_v19 }
0x15d5   :  { %6921 = vmatpush3.bf16.msra.mxu1 %v6904_v62  ;;  %6405 = vmatprep.mubr.msk.f32.mxu1 %vm71_vm0, %v7424_v23 }
0x15d6   :  { %6923 = vmatprep.subr.bf16.mxu1 %v6908_v49 }
0x15d8   :  { %6406 = vmatmul.mubr.msk.f32.gmra.mrb[60].mxu1 %vm71_vm0, %v7433_v24 }
0x15d9   :  { %6925 = vmatpush3.bf16.msra.mxu1 %v6908_v49  ;;  %6427 = vmatprep.mubr.msk.f32.mxu1 %vm71_vm0, %v7749_v59  ;;  %v7863_v49 = vld [vmem:[%s8212_s2 + $0x40] sm:$0xff] }
0x15da   :  { %6939 = vmatprep.subr.bf16.mxu1 %v7216_v30 }
0x15dc   :  { %6428 = vmatmul.mubr.msk.f32.vlgmr.msra.gmra.mrb[62].mxu1 %vm71_vm0, %v7757_v60 }
0x15dd   :  { %6430 = vmatprep.mubr.msk.f32.mxu1 %vm71_vm0, %v7764_v5  ;;  %6941 = vmatpush3.bf16.msra.mxu1 %v7216_v30 }
0x15de   :  { %6951 = vmatprep.subr.bf16.mxu1 %v7216_v30 }
0x15e0   :  { %6431 = vmatmul.mubr.msk.f32.gmra.mrb[64].mxu1 %vm71_vm0, %v7773_v7 }
0x16a7   :  { %v6404_v19 = vpop.f32.mrb[58].mxu1 }
0x16a8   :  { %v3046_v23 = vadd.f32 %v6404_v19, %v7453_v32  ;;  %v3040_v24 = vpop.f32.mrb[59].mxu1  ;;  %v5525_v32 = vld [vmem:[%s8210_s0 + $0xa0] sm:$0xff] }
0x16a9   :  { %v3041_v9 = vadd.f32 %v7458_v33, %v3040_v24 }
0x16aa   :  { %v3060_v1 = vmax.f32 %v3046_v23, 0.0 }
0x16ab   :  { %v3059_v50 = vmax.f32 %v3041_v9, 0.0  ;;  %v6407_v11 = vpop.f32.mrb[60].mxu1 }
0x16ac   :  { %v3056_v12 = vadd.f32 %v6407_v11, %v7465_v40  ;;  %v3050_v13 = vpop.f32.mrb[61].mxu1 }
0x16ad   :  { %v6913_v14 = vpack.c.bf16 %v3060_v1, %v3059_v50  ;;  %v3051_v51 = vadd.f32 %v7470_v42, %v3050_v13  ;;  %v5527_v42 = vld [vmem:[%s8210_s0 + $0xb0] sm:$0xff]  ;;  %v7876_v50 = vld [vmem:[%s8210_s0 + $0x188] sm:$0xff]  ;;  %v7882_v13 = vld [vmem:[%s8210_s0 + $0x180] sm:$0xff] }
0x16ae   :  { %v3062_v55 = vmax.f32 %v3056_v12, 0.0 }
0x16af   :  { %v3061_v2 = vmax.f32 %v3051_v51, 0.0  ;;  %6914 = vmatpush3.bf16.msra.mxu0 %v6913_v14  ;;  %v6429_v3 = vpop.f32.mrb[62].mxu1 }
0x16b0   :  { %6915 = vmatprep.subr.bf16.mxu0 %v7130_v25  ;;  %v3204_v8 = vpop.f32.mrb[63].mxu1  ;;  %v3210_v28 = vadd.f32 %v6429_v3, %v5526_v21  ;;  %v7888_v3 = vld [vmem:[%s8210_s0 + $0x198] sm:$0xff] }
0x16b1   :  { %v6916_v33 = vpack.c.bf16 %v3062_v55, %v3061_v2  ;;  %v3205_v10 = vadd.f32 %v5525_v32, %v3204_v8 }
0x16b3   :  { %6917 = vmatpush3.bf16.msra.mxu0 %v6916_v33  ;;  %v6432_v20 = vpop.f32.mrb[64].mxu1 }
0x16b4   :  { %6927 = vmatprep.subr.bf16.mxu0 %v7216_v30  ;;  %v3214_v40 = vpop.f32.mrb[65].mxu1  ;;  %v3220_v16 = vadd.f32 %v6432_v20, %v5528_v15  ;;  %v7914_v15 = vld [vmem:[%s8212_s2 + $0x58] sm:$0xff] }
0x16b5   :  { %v3215_v22 = vadd.f32 %v5527_v42, %v3214_v40 }
0x16b6   :  { %6417 = vmatmul.mubr.msk.f32.vlgmr.msra.gmra.mrb[60].mxu0 %vm71_vm0, %v7481_v6  ;;  %v7805_v6 = vld [vmem:[%s8212_s2 + $0x20] sm:$0xff] }
0x16b7   :  { %6929 = vmatpush3.bf16.msra.mxu0 %v7216_v30  ;;  %6437 = vmatprep.mubr.msk.f32.mxu0 %vm280_vm1, %v3205_v10  ;;  %v7894_v10 = vld [vmem:[%s8210_s0 + $0x190] sm:$0xff] }
0x16ba   :  { %6438 = vmatmul.mubr.msk.f32.vlgmr.msra.gmra.mrb[62].mxu0 %vm280_vm1, %v3210_v28  ;;  %v7907_v28 = vld [vmem:[%s8212_s2 + $0x50] sm:$0xff] }
0x16bb   :  { %6440 = vmatprep.mubr.msk.f32.mxu0 %vm280_vm1, %v3215_v22  ;;  %v7900_v22 = vld [vmem:[%s8212_s2 + $0x48] sm:$0xff] }
0x16be   :  { %6441 = vmatmul.mubr.msk.f32.gmra.mrb[64].mxu0 %vm280_vm1, %v3220_v16  ;;  %v7921_v16 = vld [vmem:[%s8212_s2 + $0x80] sm:$0xff] }
0x16bf   :  { %6451 = vmatprep.mubr.msk.f32.mxu0 %vm71_vm0, %v7805_v6 }
0x1789   :  { %v3129_v17 = vpop.f32.mrb[60].mxu0 }
0x178a   :  { %v3130_v37 = vadd.f32 %v3129_v17, %v7594_v35  ;;  %v6418_v41 = vpop.f32.mrb[61].mxu0 }
0x178c   :  { %v5325_v43 = vrot.slane %v3130_v37, %v7599_v39 }
0x178d   :  { %v6439_v44 = vpop.f32.mrb[62].mxu0 }
0x178e   :  { %v7813_v45 = vsel %vm5321_vm7, %v5325_v43, %v7698_v27  ;;  %v3307_v47 = vadd.f32 %v7818_v46, %v6439_v44  ;;  %v3301_v29 = vpop.f32.mrb[63].mxu0  ;;  %v7830_v27 = vld [vmem:[%s8210_s0 + $0x178] sm:$0xff] }
0x178f   :  { %v3302_v36 = vadd.f32 %v7824_v31, %v3301_v29 }
0x1790   :  { %v3321_v38 = vmax.f32 %v3307_v47, 0.0  ;;  %v7934_v47 = vld [vmem:[%s8210_s0 + $0x1a8] sm:$0xff] }
0x1791   :  { %v3320_v48 = vmax.f32 %v3302_v36, 0.0  ;;  %v6442_v52 = vpop.f32.mrb[64].mxu0 }
0x1792   :  { %v3317_v53 = vadd.f32 %v7830_v27, %v6442_v52  ;;  %v3311_v58 = vpop.f32.mrb[65].mxu0 }
0x1793   :  { %v6930_v18 = vpack.c.bf16 %v3321_v38, %v3320_v48  ;;  %v3312_v56 = vadd.f32 %v7836_v54, %v3311_v58  ;;  %v7940_v38 = vld [vmem:[%s8210_s0 + $0x1a0] sm:$0xff] }
0x1794   :  { %v3323_v57 = vmax.f32 %v3317_v53, 0.0 }
0x1795   :  { %v3322_v61 = vmax.f32 %v3312_v56, 0.0  ;;  %6931 = vmatprep.subr.bf16.mxu0 %v6930_v18 }
0x1796   :  { %6933 = vmatpush3.bf16.msra.mxu0 %v6930_v18  ;;  %v7946_v18 = vld [vmem:[%s8210_s0 + $0x1b8] sm:$0xff] }
0x1797   :  { %v6934_v62 = vpack.c.bf16 %v3323_v57, %v3322_v61 }
0x1799   :  { %6935 = vmatprep.subr.bf16.mxu0 %v6934_v62 }
0x179a   :  { %6937 = vmatpush3.bf16.msra.mxu0 %v6934_v62  ;;  %v7952_v62 = vld [vmem:[%s8210_s0 + $0x1b0] sm:$0xff] }
0x179d   :  { %6452 = vmatmul.mubr.msk.f32.vlgmr.msra.gmra.mrb[66].mxu0 %vm71_vm0, %v7842_v0 }
0x179e   :  { %6454 = vmatprep.mubr.msk.f32.mxu0 %vm71_vm0, %v7849_v63 }
0x17a1   :  { %6455 = vmatmul.mubr.msk.f32.gmra.mrb[68].mxu0 %vm71_vm0, %v7856_v4 }
0x17a2   :  { %6475 = vmatprep.mubr.msk.f32.mxu0 %vm71_vm0, %v7863_v49 }
0x1870   :  { %v6453_v19 = vpop.f32.mrb[66].mxu0 }
0x1871   :  { %v3390_v23 = vpop.f32.mrb[67].mxu0 }
0x1872   :  { %6461 = vmatprep.mubr.msk.f32.mxu1 %vm280_vm1, %v3390_v23 }
0x1873   :  { %6462 = vmatmul.mubr.msk.f32.vlgmr.msra.gmra.mrb[66].mxu1 %vm280_vm1, %v6453_v19 }
0x1874   :  { %v6456_v24 = vpop.f32.mrb[68].mxu0  ;;  %6953 = vmatpush3.bf16.msra.mxu1 %v7216_v30 }
0x1875   :  { %v3400_v9 = vpop.f32.mrb[69].mxu0  ;;  %6962 = vmatprep.subr.bf16.mxu1 %v7130_v25 }
0x1876   :  { %6464 = vmatprep.mubr.msk.f32.mxu1 %vm280_vm1, %v3400_v9 }
0x1877   :  { %6465 = vmatmul.mubr.msk.f32.gmra.mrb[68].mxu1 %vm280_vm1, %v6456_v24 }
0x1946   :  { %v6463_v1 = vpop.f32.mrb[66].mxu1 }
0x1947   :  { %v3493_v11 = vadd.f32 %v7876_v50, %v6463_v1  ;;  %v3487_v12 = vpop.f32.mrb[67].mxu1  ;;  %v7958_v1 = vld [vmem:[%s8212_s2 + $0x88] sm:$0xff] }
0x1948   :  { %v3488_v14 = vadd.f32 %v7882_v13, %v3487_v12  ;;  %v7972_v12 = vld [vmem:[%s8212_s2 + $0x98] sm:$0xff] }
0x1949   :  { %v3507_v51 = vmax.f32 %v3493_v11, 0.0  ;;  %v7965_v11 = vld [vmem:[%s8212_s2 + $0x90] sm:$0xff] }
0x194a   :  { %v3506_v55 = vmax.f32 %v3488_v14, 0.0  ;;  %v6466_v2 = vpop.f32.mrb[68].mxu1 }
0x194b   :  { %v3503_v8 = vadd.f32 %v7888_v3, %v6466_v2  ;;  %v3497_v32 = vpop.f32.mrb[69].mxu1 }
0x194c   :  { %v6942_v33 = vpack.c.bf16 %v3507_v51, %v3506_v55  ;;  %v3498_v20 = vadd.f32 %v7894_v10, %v3497_v32  ;;  %v7990_v51 = vld [vmem:[%s8210_s0 + $0x1c8] sm:$0xff] }
0x194d   :  { %v3509_v40 = vmax.f32 %v3503_v8, 0.0  ;;  %v7996_v8 = vld [vmem:[%s8210_s0 + $0x1c0] sm:$0xff] }
0x194e   :  { %v3508_v42 = vmax.f32 %v3498_v20, 0.0  ;;  %6943 = vmatprep.subr.bf16.mxu0 %v6942_v33 }
0x194f   :  { %6945 = vmatpush3.bf16.msra.mxu0 %v6942_v33 }
0x1950   :  { %v6946_v21 = vpack.c.bf16 %v3509_v40, %v3508_v42  ;;  %v8002_v42 = vld [vmem:[%s8210_s0 + $0x1d8] sm:$0xff] }
0x1952   :  { %6947 = vmatprep.subr.bf16.mxu0 %v6946_v21 }
0x1953   :  { %6949 = vmatpush3.bf16.msra.mxu0 %v6946_v21 }
0x1956   :  { %6476 = vmatmul.mubr.msk.f32.vlgmr.msra.gmra.mrb[70].mxu0 %vm71_vm0, %v7900_v22 }
0x1957   :  { %6478 = vmatprep.mubr.msk.f32.mxu0 %vm71_vm0, %v7907_v28 }
0x195a   :  { %6479 = vmatmul.mubr.msk.f32.gmra.mrb[72].mxu0 %vm71_vm0, %v7914_v15 }
0x195b   :  { %6499 = vmatprep.mubr.msk.f32.mxu0 %vm71_vm0, %v7921_v16 }
0x1a29   :  { %v6477_v17 = vpop.f32.mrb[70].mxu0 }
0x1a2a   :  { %v3576_v37 = vpop.f32.mrb[71].mxu0 }
0x1a2b   :  { %6485 = vmatprep.mubr.msk.f32.mxu1 %vm280_vm1, %v3576_v37 }
0x1a2c   :  { %6486 = vmatmul.mubr.msk.f32.vlgmr.msra.gmra.mrb[70].mxu1 %vm280_vm1, %v6477_v17 }
0x1a2d   :  { %v6480_v41 = vpop.f32.mrb[72].mxu0 }
0x1a2e   :  { %v3586_v43 = vpop.f32.mrb[73].mxu0 }
0x1a2f   :  { %6488 = vmatprep.mubr.msk.f32.mxu1 %vm280_vm1, %v3586_v43 }
0x1a30   :  { %6489 = vmatmul.mubr.msk.f32.gmra.mrb[72].mxu1 %vm280_vm1, %v6480_v41  ;;  %v8008_v41 = vld [vmem:[%s8210_s0 + $0x1d0] sm:$0xff] }
0x1a31   :  { %6513 = vmatprep.mubr.msk.f32.mxu1 %vm7131_vm2, %v7132_v26 }
0x1aff   :  { %v6487_v44 = vpop.f32.mrb[70].mxu1 }
0x1b00   :  { %v3679_v29 = vadd.f32 %v7934_v47, %v6487_v44  ;;  %v3673_v36 = vpop.f32.mrb[71].mxu1 }
0x1b01   :  { %v3674_v48 = vadd.f32 %v7940_v38, %v3673_v36 }
0x1b02   :  { %v3693_v52 = vmax.f32 %v3679_v29, 0.0 }
0x1b03   :  { %v3692_v53 = vmax.f32 %v3674_v48, 0.0  ;;  %v6490_v58 = vpop.f32.mrb[72].mxu1 }
0x1b04   :  { %v3689_v56 = vadd.f32 %v7946_v18, %v6490_v58  ;;  %v3683_v57 = vpop.f32.mrb[73].mxu1 }
0x1b05   :  { %v6954_v61 = vpack.c.bf16 %v3693_v52, %v3692_v53  ;;  %v3684_v19 = vadd.f32 %v7952_v62, %v3683_v57  ;;  %v5558_v52 = vld [vmem:[%s8210_s0 + $0xc0] sm:$0xff] }
0x1b06   :  { %v3695_v23 = vmax.f32 %v3689_v56, 0.0 }
0x1b07   :  { %v3694_v24 = vmax.f32 %v3684_v19, 0.0  ;;  %6955 = vmatprep.subr.bf16.mxu0 %v6954_v61  ;;  %v5559_v19 = vld [vmem:[%s8210_s0 + $0xc8] sm:$0xff] }
0x1b08   :  { %6957 = vmatpush3.bf16.msra.mxu0 %v6954_v61 }
0x1b09   :  { %v6958_v9 = vpack.c.bf16 %v3695_v23, %v3694_v24  ;;  %v8025_v23 = vld [vmem:[%s8212_s2 + $0xa0] sm:$0x1] }
0x1b0b   :  { %6959 = vmatprep.subr.bf16.mxu0 %v6958_v9 }
0x1b0c   :  { %6961 = vmatpush3.bf16.msra.mxu0 %v6958_v9 }
0x1b0d   :  { %6969 = vmatprep.subr.bf16.mxu0 %v6954_v61 }
0x1b0f   :  { %6500 = vmatmul.mubr.msk.f32.vlgmr.msra.gmra.mrb[74].mxu0 %vm71_vm0, %v7958_v1 }
0x1b10   :  { %6971 = vmatpush3.bf16.msra.mxu0 %v6954_v61  ;;  %6502 = vmatprep.mubr.msk.f32.mxu0 %vm71_vm0, %v7965_v11  ;;  %v5560_v61 = vld [vmem:[%s8210_s0 + $0xd0] sm:$0xff] }
0x1b11   :  { %6973 = vmatprep.subr.bf16.mxu0 %v6958_v9 }
0x1b13   :  { %6503 = vmatmul.mubr.msk.f32.gmra.mrb[76].mxu0 %vm71_vm0, %v7972_v12 }
0x1b14   :  { %6975 = vmatpush3.bf16.msra.mxu0 %v6958_v9  ;;  %6524 = vmatprep.mubr.msk.f32.mxu0 %vm71_vm0, %v7749_v59 }
0x1b15   :  { %6989 = vmatprep.subr.bf16.mxu0 %v7216_v30 }
0x1b17   :  { %6525 = vmatmul.mubr.msk.f32.vlgmr.msra.gmra.mrb[78].mxu0 %vm71_vm0, %v7757_v60 }
0x1b18   :  { %6527 = vmatprep.mubr.msk.f32.mxu0 %vm71_vm0, %v7764_v5  ;;  %6991 = vmatpush3.bf16.msra.mxu0 %v7216_v30 }
0x1b19   :  { %7001 = vmatprep.subr.bf16.mxu0 %v7216_v30 }
0x1b1b   :  { %6528 = vmatmul.mubr.msk.f32.gmra.mrb[80].mxu0 %vm71_vm0, %v7773_v7 }
0x1be2   :  { %v6501_v14 = vpop.f32.mrb[74].mxu0 }
0x1be3   :  { %v3768_v55 = vadd.f32 %v7990_v51, %v6501_v14  ;;  %v3762_v2 = vpop.f32.mrb[75].mxu0  ;;  %v5561_v14 = vld [vmem:[%s8210_s0 + $0xd8] sm:$0xff] }
0x1be4   :  { %v3763_v32 = vadd.f32 %v7996_v8, %v3762_v2 }
0x1be5   :  { %v3782_v33 = vmax.f32 %v3768_v55, 0.0 }
0x1be6   :  { %v3781_v20 = vmax.f32 %v3763_v32, 0.0  ;;  %v6504_v40 = vpop.f32.mrb[76].mxu0 }
0x1be7   :  { %v3778_v21 = vadd.f32 %v8002_v42, %v6504_v40  ;;  %v3772_v17 = vpop.f32.mrb[77].mxu0 }
0x1be8   :  { %v6963_v37 = vpack.c.bf16 %v3782_v33, %v3781_v20  ;;  %v3773_v43 = vadd.f32 %v8008_v41, %v3772_v17 }
0x1be9   :  { %v3784_v44 = vmax.f32 %v3778_v21, 0.0 }
0x1bea   :  { %v3783_v29 = vmax.f32 %v3773_v43, 0.0  ;;  %6964 = vmatpush3.bf16.msra.mxu1 %v6963_v37  ;;  %v6526_v36 = vpop.f32.mrb[78].mxu0 }
0x1beb   :  { %6965 = vmatprep.subr.bf16.mxu1 %v7130_v25  ;;  %v3926_v48 = vpop.f32.mrb[79].mxu0  ;;  %v3932_v9 = vadd.f32 %v6526_v36, %v5559_v19 }
0x1bec   :  { %v6966_v53 = vpack.c.bf16 %v3784_v44, %v3783_v29  ;;  %v3927_v58 = vadd.f32 %v5558_v52, %v3926_v48 }
0x1bee   :  { %6967 = vmatpush3.bf16.msra.mxu1 %v6966_v53  ;;  %v6529_v56 = vpop.f32.mrb[80].mxu0 }
0x1bef   :  { %6977 = vmatprep.subr.bf16.mxu1 %v7216_v30  ;;  %v3936_v57 = vpop.f32.mrb[81].mxu0  ;;  %v3942_v55 = vadd.f32 %v6529_v56, %v5561_v14 }
0x1bf0   :  { %v3937_v24 = vadd.f32 %v5560_v61, %v3936_v57 }
0x1bf1   :  { %6514 = vmatmul.mubr.msk.f32.vlgmr.msra.gmra.mrb[74].mxu1 %vm71_vm0, %v8025_v23 }
0x1bf2   :  { %6979 = vmatpush3.bf16.msra.mxu1 %v7216_v30  ;;  %6534 = vmatprep.mubr.msk.f32.mxu1 %vm280_vm1, %v3927_v58 }
0x1bf5   :  { %6535 = vmatmul.mubr.msk.f32.vlgmr.msra.gmra.mrb[76].mxu1 %vm280_vm1, %v3932_v9 }
0x1bf6   :  { %6537 = vmatprep.mubr.msk.f32.mxu1 %vm280_vm1, %v3937_v24 }
0x1bf9   :  { %6538 = vmatmul.mubr.msk.f32.gmra.mrb[78].mxu1 %vm280_vm1, %v3942_v55 }
0x1bfa   :  { %6548 = vmatprep.mubr.msk.f32.mxu1 %vm71_vm0, %v7805_v6 }
0x1cc4   :  { %v3851_v2 = vpop.f32.mrb[74].mxu1 }
0x1cc5   :  { %v3852_v32 = vadd.f32 %v3851_v2, %v7594_v35  ;;  %v6515_v33 = vpop.f32.mrb[75].mxu1 }
0x1cc7   :  { %v5331_v20 = vrot.slane %v3852_v32, %v7599_v39 }
0x1cc8   :  { %v6536_v40 = vpop.f32.mrb[76].mxu1 }
0x1cc9   :  { %v8043_v21 = vsel %vm5327_vm8, %v5331_v20, %v7813_v45  ;;  %v4029_v17 = vadd.f32 %v7818_v46, %v6536_v40  ;;  %v4023_v37 = vpop.f32.mrb[77].mxu1 }
0x1cca   :  { %v4024_v43 = vadd.f32 %v7824_v31, %v4023_v37 }
0x1ccb   :  { %v4043_v44 = vmax.f32 %v4029_v17, 0.0 }
0x1ccc   :  { %v4042_v29 = vmax.f32 %v4024_v43, 0.0  ;;  %v6539_v36 = vpop.f32.mrb[78].mxu1 }
0x1ccd   :  { %v4039_v48 = vadd.f32 %v7830_v27, %v6539_v36  ;;  %v4033_v35 = vpop.f32.mrb[79].mxu1 }
0x1cce   :  { %v6980_v52 = vpack.c.bf16 %v4043_v44, %v4042_v29  ;;  %v4034_v53 = vadd.f32 %v7836_v54, %v4033_v35 }
0x1ccf   :  { %v4045_v58 = vmax.f32 %v4039_v48, 0.0 }
0x1cd0   :  { %v4044_v56 = vmax.f32 %v4034_v53, 0.0  ;;  %6981 = vmatprep.subr.bf16.mxu1 %v6980_v52 }
0x1cd1   :  { %6983 = vmatpush3.bf16.msra.mxu1 %v6980_v52 }
0x1cd2   :  { %v6984_v45 = vpack.c.bf16 %v4045_v58, %v4044_v56 }
0x1cd4   :  { %6985 = vmatprep.subr.bf16.mxu1 %v6984_v45 }
0x1cd5   :  { %6987 = vmatpush3.bf16.msra.mxu1 %v6984_v45 }
0x1cd8   :  { %6549 = vmatmul.mubr.msk.f32.vlgmr.msra.gmra.mrb[80].mxu1 %vm71_vm0, %v7842_v0 }
0x1cd9   :  { %6551 = vmatprep.mubr.msk.f32.mxu1 %vm71_vm0, %v7849_v63 }
0x1cdc   :  { %6552 = vmatmul.mubr.msk.f32.gmra.mrb[82].mxu1 %vm71_vm0, %v7856_v4 }
0x1cdd   :  { %6572 = vmatprep.mubr.msk.f32.mxu1 %vm71_vm0, %v7863_v49 }
0x1dab   :  { %v6550_v57 = vpop.f32.mrb[80].mxu1 }
0x1dac   :  { %v4112_v61 = vpop.f32.mrb[81].mxu1 }
0x1dad   :  { %6558 = vmatprep.mubr.msk.f32.mxu0 %vm280_vm1, %v4112_v61 }
0x1dae   :  { %6559 = vmatmul.mubr.msk.f32.vlgmr.msra.gmra.mrb[82].mxu0 %vm280_vm1, %v6550_v57 }
0x1daf   :  { %v6553_v19 = vpop.f32.mrb[82].mxu1  ;;  %7003 = vmatpush3.bf16.msra.mxu0 %v7216_v30 }
0x1db0   :  { %v4122_v24 = vpop.f32.mrb[83].mxu1  ;;  %7012 = vmatprep.subr.bf16.mxu0 %v7130_v25 }
0x1db1   :  { %6561 = vmatprep.mubr.msk.f32.mxu0 %vm280_vm1, %v4122_v24 }
0x1db2   :  { %6562 = vmatmul.mubr.msk.f32.gmra.mrb[84].mxu0 %vm280_vm1, %v6553_v19 }
0x1e81   :  { %v6560_v9 = vpop.f32.mrb[82].mxu0 }
0x1e82   :  { %v4215_v14 = vadd.f32 %v7876_v50, %v6560_v9  ;;  %v4209_v55 = vpop.f32.mrb[83].mxu0 }
0x1e83   :  { %v4210_v2 = vadd.f32 %v7882_v13, %v4209_v55 }
0x1e84   :  { %v4229_v32 = vmax.f32 %v4215_v14, 0.0 }
0x1e85   :  { %v4228_v33 = vmax.f32 %v4210_v2, 0.0  ;;  %v6563_v20 = vpop.f32.mrb[84].mxu0 }
0x1e86   :  { %v4225_v40 = vadd.f32 %v7888_v3, %v6563_v20  ;;  %v4219_v17 = vpop.f32.mrb[85].mxu0 }
0x1e87   :  { %v6992_v37 = vpack.c.bf16 %v4229_v32, %v4228_v33  ;;  %v4220_v43 = vadd.f32 %v7894_v10, %v4219_v17 }
0x1e88   :  { %v4231_v44 = vmax.f32 %v4225_v40, 0.0 }
0x1e89   :  { %v4230_v29 = vmax.f32 %v4220_v43, 0.0  ;;  %6993 = vmatprep.subr.bf16.mxu1 %v6992_v37 }
0x1e8a   :  { %6995 = vmatpush3.bf16.msra.mxu1 %v6992_v37 }
0x1e8b   :  { %v6996_v36 = vpack.c.bf16 %v4231_v44, %v4230_v29 }
0x1e8d   :  { %6997 = vmatprep.subr.bf16.mxu1 %v6996_v36 }
0x1e8e   :  { %6999 = vmatpush3.bf16.msra.mxu1 %v6996_v36 }
0x1e91   :  { %6573 = vmatmul.mubr.msk.f32.vlgmr.msra.gmra.mrb[84].mxu1 %vm71_vm0, %v7900_v22 }
0x1e92   :  { %6575 = vmatprep.mubr.msk.f32.mxu1 %vm71_vm0, %v7907_v28 }
0x1e95   :  { %6576 = vmatmul.mubr.msk.f32.gmra.mrb[86].mxu1 %vm71_vm0, %v7914_v15 }
0x1e96   :  { %6596 = vmatprep.mubr.msk.f32.mxu1 %vm71_vm0, %v7921_v16 }
0x1f64   :  { %v6574_v48 = vpop.f32.mrb[84].mxu1 }
0x1f65   :  { %v4298_v35 = vpop.f32.mrb[85].mxu1 }
0x1f66   :  { %6582 = vmatprep.mubr.msk.f32.mxu0 %vm280_vm1, %v4298_v35 }
0x1f67   :  { %6583 = vmatmul.mubr.msk.f32.vlgmr.msra.gmra.mrb[86].mxu0 %vm280_vm1, %v6574_v48 }
0x1f68   :  { %v6577_v52 = vpop.f32.mrb[86].mxu1 }
0x1f69   :  { %v4308_v53 = vpop.f32.mrb[87].mxu1 }
0x1f6a   :  { %6585 = vmatprep.mubr.msk.f32.mxu0 %vm280_vm1, %v4308_v53 }
0x1f6b   :  { %6586 = vmatmul.mubr.msk.f32.gmra.mrb[88].mxu0 %vm280_vm1, %v6577_v52 }
0x1f6c   :  { %6610 = vmatprep.mubr.msk.f32.mxu0 %vm7131_vm2, %v7132_v26 }
0x203a   :  { %v6584_v58 = vpop.f32.mrb[86].mxu0 }
0x203b   :  { %v4401_v56 = vadd.f32 %v7934_v47, %v6584_v58  ;;  %v4395_v45 = vpop.f32.mrb[87].mxu0  ;;  %v5591_v58 = vld [vmem:[%s8210_s0 + $0xe0] sm:$0xff] }
0x203c   :  { %v4396_v57 = vadd.f32 %v7940_v38, %v4395_v45 }
0x203d   :  { %v4415_v61 = vmax.f32 %v4401_v56, 0.0 }
0x203e   :  { %v4414_v19 = vmax.f32 %v4396_v57, 0.0  ;;  %v6587_v24 = vpop.f32.mrb[88].mxu0 }
0x203f   :  { %v4411_v9 = vadd.f32 %v7946_v18, %v6587_v24  ;;  %v4405_v14 = vpop.f32.mrb[89].mxu0  ;;  %v5592_v24 = vld [vmem:[%s8210_s0 + $0xe8] sm:$0xff] }
0x2040   :  { %v7004_v55 = vpack.c.bf16 %v4415_v61, %v4414_v19  ;;  %v4406_v2 = vadd.f32 %v7952_v62, %v4405_v14  ;;  %v5593_v19 = vld [vmem:[%s8210_s0 + $0xf0] sm:$0xff] }
0x2041   :  { %v4417_v32 = vmax.f32 %v4411_v9, 0.0 }
0x2042   :  { %v4416_v33 = vmax.f32 %v4406_v2, 0.0  ;;  %7005 = vmatprep.subr.bf16.mxu1 %v7004_v55 }
0x2043   :  { %7007 = vmatpush3.bf16.msra.mxu1 %v7004_v55 }
0x2044   :  { %v7008_v20 = vpack.c.bf16 %v4417_v32, %v4416_v33  ;;  %v8132_v33 = vld [vmem:[%s8210_s0 + $0x1] sm:$0x1] }
0x2046   :  { %7009 = vmatprep.subr.bf16.mxu1 %v7008_v20 }
0x2047   :  { %7011 = vmatpush3.bf16.msra.mxu1 %v7008_v20 }
0x2048   :  { %7019 = vmatprep.subr.bf16.mxu1 %v7004_v55 }
0x204a   :  { %6597 = vmatmul.mubr.msk.f32.vlgmr.msra.gmra.mrb[88].mxu1 %vm71_vm0, %v7958_v1 }
0x204b   :  { %7021 = vmatpush3.bf16.msra.mxu1 %v7004_v55  ;;  %6599 = vmatprep.mubr.msk.f32.mxu1 %vm71_vm0, %v7965_v11  ;;  %v5594_v55 = vld [vmem:[%s8210_s0 + $0xf8] sm:$0xff]  ;;  %s7133_s0 = smov [#allocation2]  }
0x204c   :  { %7023 = vmatprep.subr.bf16.mxu1 %v7008_v20  ;;  %s5352_s18 = sshll.u32 %s7133_s0, 4  ;;  %s5353_s18 = int_to_ptr.vmem [resolvable:$true] %s5352_s18 }
0x204d   :  { %s7106_s19 = scalar_lea.vmem %s5353_s18, 128  ;;  %p7111_p1 = scmp.lt.s32.totalorder %s5353_s18, %s5353_s18 }
0x204e   :  { %6600 = vmatmul.mubr.msk.f32.gmra.mrb[90].mxu1 %vm71_vm0, %v7972_v12  ;;  %p7107_p0 = scmp.ne.s32.totalorder %s5353_s18, %s7106_s19  ;;  %p7112_p2 = scmp.lt.s32.totalorder %s7106_s19, %s7106_s19 }
0x204f   :  { %7025 = vmatpush3.bf16.msra.mxu1 %v7008_v20  ;;  %6621 = vmatprep.mubr.msk.f32.mxu1 %vm71_vm0, %v7749_v59 }
0x2050   :  { %7039 = vmatprep.subr.bf16.mxu1 %v7216_v30  ;;  %p7113_p3 = por %p7112_p2, %p7111_p1 }
0x2052   :  { %6622 = vmatmul.mubr.msk.f32.vlgmr.msra.gmra.mrb[92].mxu1 %vm71_vm0, %v7757_v60  ;;  %p7114_p4 = pnand %p7113_p3, %p7107_p0 }
0x2053   :  { %6624 = vmatprep.mubr.msk.f32.mxu1 %vm71_vm0, %v7764_v5  ;;  %7041 = vmatpush3.bf16.msra.mxu1 %v7216_v30 }
0x2054   :  { %7051 = vmatprep.subr.bf16.mxu1 %v7216_v30 }
0x2056   :  { %6625 = vmatmul.mubr.msk.f32.gmra.mrb[94].mxu1 %vm71_vm0, %v7773_v7 }
0x211d   :  { %v6598_v40 = vpop.f32.mrb[88].mxu1 }
0x211e   :  { %v4490_v17 = vadd.f32 %v7990_v51, %v6598_v40  ;;  %v4484_v37 = vpop.f32.mrb[89].mxu1 }
0x211f   :  { %v4485_v59 = vadd.f32 %v7996_v8, %v4484_v37 }
0x2120   :  { %v4504_v43 = vmax.f32 %v4490_v17, 0.0 }
0x2121   :  { %v4503_v44 = vmax.f32 %v4485_v59, 0.0  ;;  %v6601_v29 = vpop.f32.mrb[90].mxu1 }
0x2122   :  { %v4500_v60 = vadd.f32 %v8002_v42, %v6601_v29  ;;  %v4494_v36 = vpop.f32.mrb[91].mxu1 }
0x2123   :  { %v7013_v5 = vpack.c.bf16 %v4504_v43, %v4503_v44  ;;  %v4495_v48 = vadd.f32 %v8008_v41, %v4494_v36 }
0x2124   :  { %v4506_v35 = vmax.f32 %v4500_v60, 0.0 }
0x2125   :  { %v4505_v52 = vmax.f32 %v4495_v48, 0.0  ;;  %7014 = vmatpush3.bf16.msra.mxu0 %v7013_v5  ;;  %v6623_v53 = vpop.f32.mrb[92].mxu1 }
0x2126   :  { %7015 = vmatprep.subr.bf16.mxu0 %v7130_v25  ;;  %v4648_v7 = vpop.f32.mrb[93].mxu1  ;;  %v4654_v14 = vadd.f32 %v6623_v53, %v5592_v24 }
0x2127   :  { %v7016_v56 = vpack.c.bf16 %v4506_v35, %v4505_v52  ;;  %v4649_v45 = vadd.f32 %v5591_v58, %v4648_v7 }
0x2129   :  { %7017 = vmatpush3.bf16.msra.mxu0 %v7016_v56  ;;  %v6626_v57 = vpop.f32.mrb[94].mxu1 }
0x212a   :  { %7027 = vmatprep.subr.bf16.mxu0 %v7216_v30  ;;  %v4658_v61 = vpop.f32.mrb[95].mxu1  ;;  %v4664_v2 = vadd.f32 %v6626_v57, %v5594_v55 }
0x212b   :  { %v4659_v9 = vadd.f32 %v5593_v19, %v4658_v61 }
0x212c   :  { %6611 = vmatmul.mubr.msk.f32.vlgmr.msra.gmra.mrb[90].mxu0 %vm71_vm0, %v8025_v23 }
0x212d   :  { %7029 = vmatpush3.bf16.msra.mxu0 %v7216_v30  ;;  %6631 = vmatprep.mubr.msk.f32.mxu0 %vm280_vm1, %v4649_v45 }
0x2130   :  { %6632 = vmatmul.mubr.msk.f32.vlgmr.msra.gmra.mrb[92].mxu0 %vm280_vm1, %v4654_v14 }
0x2131   :  { %6634 = vmatprep.mubr.msk.f32.mxu0 %vm280_vm1, %v4659_v9 }
0x2134   :  { %6635 = vmatmul.mubr.msk.f32.gmra.mrb[94].mxu0 %vm280_vm1, %v4664_v2 }
0x2135   :  { %6645 = vmatprep.mubr.msk.f32.mxu0 %vm71_vm0, %v7805_v6 }
0x21ff   :  { %v4573_v32 = vpop.f32.mrb[90].mxu0 }
0x2200   :  { %v4574_v20 = vadd.f32 %v8132_v33, %v4573_v32  ;;  %v6612_v40 = vpop.f32.mrb[91].mxu0 }
0x2202   :  { %v5337_v17 = vrot.slane %v4574_v20, %v7599_v39 }
0x2203   :  { %v6633_v37 = vpop.f32.mrb[92].mxu0 }
0x2204   :  { %v4751_v59 = vadd.f32 %v7818_v46, %v6633_v37  ;;  %v4745_v43 = vpop.f32.mrb[93].mxu0  ;;  %v8139_v44 = vsel %vm5333_vm9, %v5337_v17, %v8043_v21 }
0x2205   :  { %v4746_v6 = vadd.f32 %v7824_v31, %v4745_v43 }
0x2206   :  { %v4765_v29 = vmax.f32 %v4751_v59, 0.0 }
0x2207   :  { %v4764_v60 = vmax.f32 %v4746_v6, 0.0  ;;  %v6636_v36 = vpop.f32.mrb[94].mxu0 }
0x2208   :  { %v4761_v5 = vadd.f32 %v7830_v27, %v6636_v36  ;;  %v4755_v48 = vpop.f32.mrb[95].mxu0 }
0x2209   :  { %v7030_v35 = vpack.c.bf16 %v4765_v29, %v4764_v60  ;;  %v4756_v52 = vadd.f32 %v7836_v54, %v4755_v48 }
0x220a   :  { %v4767_v53 = vmax.f32 %v4761_v5, 0.0 }
0x220b   :  { %v4766_v7 = vmax.f32 %v4756_v52, 0.0  ;;  %7031 = vmatprep.subr.bf16.mxu0 %v7030_v35 }
0x220c   :  { %7033 = vmatpush3.bf16.msra.mxu0 %v7030_v35 }
0x220d   :  { %v7034_v46 = vpack.c.bf16 %v4767_v53, %v4766_v7 }
0x220f   :  { %7035 = vmatprep.subr.bf16.mxu0 %v7034_v46 }
0x2210   :  { %7037 = vmatpush3.bf16.msra.mxu0 %v7034_v46 }
0x2213   :  { %6646 = vmatmul.mubr.msk.f32.vlgmr.msra.gmra.mrb[96].mxu0 %vm71_vm0, %v7842_v0 }
0x2214   :  { %6648 = vmatprep.mubr.msk.f32.mxu0 %vm71_vm0, %v7849_v63 }
0x2217   :  { %6649 = vmatmul.mubr.msk.f32.gmra.mrb[98].mxu0 %vm71_vm0, %v7856_v4 }
0x2218   :  { %6669 = vmatprep.mubr.msk.f32.mxu0 %vm71_vm0, %v7863_v49 }
0x22e6   :  { %v6647_v31 = vpop.f32.mrb[96].mxu0 }
0x22e7   :  { %v4834_v27 = vpop.f32.mrb[97].mxu0 }
0x22e8   :  { %6655 = vmatprep.mubr.msk.f32.mxu1 %vm280_vm1, %v4834_v27 }
0x22e9   :  { %6656 = vmatmul.mubr.msk.f32.vlgmr.msra.gmra.mrb[96].mxu1 %vm280_vm1, %v6647_v31 }
0x22ea   :  { %v6650_v54 = vpop.f32.mrb[98].mxu0  ;;  %7053 = vmatpush3.bf16.msra.mxu1 %v7216_v30 }
0x22eb   :  { %v4844_v21 = vpop.f32.mrb[99].mxu0  ;;  %7062 = vmatprep.subr.bf16.mxu1 %v7130_v25 }
0x22ec   :  { %6658 = vmatprep.mubr.msk.f32.mxu1 %vm280_vm1, %v4844_v21 }
0x22ed   :  { %6659 = vmatmul.mubr.msk.f32.gmra.mrb[98].mxu1 %vm280_vm1, %v6650_v54 }
0x23bc   :  { %v6657_v0 = vpop.f32.mrb[96].mxu1 }
0x23bd   :  { %v4937_v63 = vadd.f32 %v7876_v50, %v6657_v0  ;;  %v4931_v4 = vpop.f32.mrb[97].mxu1 }
0x23be   :  { %v4932_v49 = vadd.f32 %v7882_v13, %v4931_v4 }
0x23bf   :  { %v4951_v58 = vmax.f32 %v4937_v63, 0.0 }
0x23c0   :  { %v4950_v56 = vmax.f32 %v4932_v49, 0.0  ;;  %v6660_v45 = vpop.f32.mrb[98].mxu1 }
0x23c1   :  { %v4947_v57 = vadd.f32 %v7888_v3, %v6660_v45  ;;  %v4941_v61 = vpop.f32.mrb[99].mxu1 }
0x23c2   :  { %v7042_v30 = vpack.c.bf16 %v4951_v58, %v4950_v56  ;;  %v4942_v19 = vadd.f32 %v7894_v10, %v4941_v61 }
0x23c3   :  { %v4953_v24 = vmax.f32 %v4947_v57, 0.0 }
0x23c4   :  { %v4952_v9 = vmax.f32 %v4942_v19, 0.0  ;;  %7043 = vmatprep.subr.bf16.mxu0 %v7042_v30 }
0x23c5   :  { %7045 = vmatpush3.bf16.msra.mxu0 %v7042_v30 }
0x23c6   :  { %v7046_v14 = vpack.c.bf16 %v4953_v24, %v4952_v9 }
0x23c8   :  { %7047 = vmatprep.subr.bf16.mxu0 %v7046_v14 }
0x23c9   :  { %7049 = vmatpush3.bf16.msra.mxu0 %v7046_v14 }
0x23cc   :  { %6670 = vmatmul.mubr.msk.f32.vlgmr.msra.gmra.mrb[100].mxu0 %vm71_vm0, %v7900_v22 }
0x23cd   :  { %6672 = vmatprep.mubr.msk.f32.mxu0 %vm71_vm0, %v7907_v28 }
0x23d0   :  { %6673 = vmatmul.mubr.msk.f32.gmra.mrb[102].mxu0 %vm71_vm0, %v7914_v15 }
0x23d1   :  { %6693 = vmatprep.mubr.msk.f32.mxu0 %vm71_vm0, %v7921_v16 }
0x249f   :  { %v6671_v50 = vpop.f32.mrb[100].mxu0 }
0x24a0   :  { %v5020_v13 = vpop.f32.mrb[101].mxu0 }
0x24a1   :  { %6679 = vmatprep.mubr.msk.f32.mxu1 %vm280_vm1, %v5020_v13 }
0x24a2   :  { %6680 = vmatmul.mubr.msk.f32.vlgmr.msra.gmra.mrb[100].mxu1 %vm280_vm1, %v6671_v50 }
0x24a3   :  { %v6674_v3 = vpop.f32.mrb[102].mxu0 }
0x24a4   :  { %v5030_v10 = vpop.f32.mrb[103].mxu0 }
0x24a5   :  { %6682 = vmatprep.mubr.msk.f32.mxu1 %vm280_vm1, %v5030_v10 }
0x24a6   :  { %6683 = vmatmul.mubr.msk.f32.gmra.mrb[102].mxu1 %vm280_vm1, %v6674_v3 }
0x24a7   :  { %6707 = vmatprep.mubr.msk.f32.mxu1 %vm7131_vm2, %v7132_v26 }
0x2575   :  { %v6681_v22 = vpop.f32.mrb[100].mxu1 }
0x2576   :  { %v5123_v28 = vadd.f32 %v7934_v47, %v6681_v22  ;;  %v5117_v15 = vpop.f32.mrb[101].mxu1 }
0x2577   :  { %v5118_v16 = vadd.f32 %v7940_v38, %v5117_v15 }
0x2578   :  { %v5137_v55 = vmax.f32 %v5123_v28, 0.0 }
0x2579   :  { %v5136_v2 = vmax.f32 %v5118_v16, 0.0  ;;  %v6684_v32 = vpop.f32.mrb[102].mxu1 }
0x257a   :  { %v5133_v20 = vadd.f32 %v7946_v18, %v6684_v32  ;;  %v5127_v40 = vpop.f32.mrb[103].mxu1 }
0x257b   :  { %v7054_v17 = vpack.c.bf16 %v5137_v55, %v5136_v2  ;;  %v5128_v37 = vadd.f32 %v7952_v62, %v5127_v40 }
0x257c   :  { %v5139_v59 = vmax.f32 %v5133_v20, 0.0 }
0x257d   :  { %v5138_v43 = vmax.f32 %v5128_v37, 0.0  ;;  %7055 = vmatprep.subr.bf16.mxu0 %v7054_v17 }
0x257e   :  { %7057 = vmatpush3.bf16.msra.mxu0 %v7054_v17 }
0x257f   :  { %v7058_v26 = vpack.c.bf16 %v5139_v59, %v5138_v43 }
0x2581   :  { %7059 = vmatprep.subr.bf16.mxu0 %v7058_v26 }
0x2582   :  { %7061 = vmatpush3.bf16.msra.mxu0 %v7058_v26 }
0x2585   :  { %6694 = vmatmul.mubr.msk.f32.vlgmr.msra.gmra.mrb[104].mxu0 %vm71_vm0, %v7958_v1 }
0x2586   :  { %6696 = vmatprep.mubr.msk.f32.mxu0 %vm71_vm0, %v7965_v11 }
0x2589   :  { %6697 = vmatmul.mubr.msk.f32.gmra.mrb[106].mxu0 %vm71_vm0, %v7972_v12 }
0x2658   :  { %v6695_v47 = vpop.f32.mrb[104].mxu0 }
0x2659   :  { %v5212_v38 = vadd.f32 %v7990_v51, %v6695_v47  ;;  %v5206_v18 = vpop.f32.mrb[105].mxu0 }
0x265a   :  { %v5207_v62 = vadd.f32 %v7996_v8, %v5206_v18 }
0x265b   :  { %v5226_v6 = vmax.f32 %v5212_v38, 0.0 }
0x265c   :  { %v5225_v29 = vmax.f32 %v5207_v62, 0.0  ;;  %v6698_v60 = vpop.f32.mrb[106].mxu0 }
0x265d   :  { %v5222_v36 = vadd.f32 %v8002_v42, %v6698_v60  ;;  %v5216_v5 = vpop.f32.mrb[107].mxu0 }
0x265e   :  { %v7063_v48 = vpack.c.bf16 %v5226_v6, %v5225_v29  ;;  %v5217_v1 = vadd.f32 %v8008_v41, %v5216_v5 }
0x265f   :  { %v5228_v35 = vmax.f32 %v5222_v36, 0.0 }
0x2660   :  { %v5227_v11 = vmax.f32 %v5217_v1, 0.0  ;;  %7064 = vmatpush3.bf16.msra.mxu1 %v7063_v48 }
0x2661   :  { %7065 = vmatprep.subr.bf16.mxu1 %v7130_v25 }
0x2662   :  { %v7066_v12 = vpack.c.bf16 %v5228_v35, %v5227_v11 }
0x2664   :  { %7067 = vmatpush3.bf16.msra.mxu1 %v7066_v12 }
0x2667   :  { %6708 = vmatmul.mubr.msk.f32.vlgmr.msra.gmra.mrb[104].mxu1 %vm71_vm0, %v8025_v23 }
0x273a   :  { %v5295_v51 = vpop.f32.mrb[104].mxu1 }
0x273b   :  { %v5296_v8 = vadd.f32 %v8132_v33, %v5295_v51  ;;  %v6709_v52 = vpop.f32.mrb[105].mxu1 }
0x273d   :  { %v5343_v42 = vrot.slane %v5296_v8, %v7599_v39 }
0x273f   :  { %v5344_v41 = vsel %vm5339_vm10, %v5343_v42, %v8139_v44 }
0x2740   :  { %5345 = vst.msk [vmem:[#allocation2] sm:$0xff] %vm280_vm1, %v5344_v41 }
0x2741   :  { %7117 = shalt.err (!%p7114_p4)
}
0x2742   :  { %s7118_s21 = scalar_lea.hbm %s8213_s3, 128 }
0x2743   :  { %p7119_p5 = scmp.ne.s32.totalorder %s8213_s3, %s7118_s21  ;;  %p7122_p6 = scmp.lt.u32.totalorder %s7118_s21, %s8213_s3 }
0x2745   :  { %p7124_p7 = pnand %p7122_p6, %p7119_p5 }
0x2747   :  { %7127 = shalt.err (!%p7124_p7)
}
0x2748   :  { %5355 = dma.vmem_to_hbm [thread:$0]  %s5353_s18, 128, %s8213_s3, [#allocation3]  }
0x2749   :  { %7128 = dma.done.wait [#allocation3], 128  }
0x274a   :  { %7129 = vsyncadd [#allocation3], 4294967168 }
0x274b   :  { %5359 = vsyncpa [#allocation3], 1 }

</bundles_post_ra>
